<compile_context>
chip_gen: v7x
topology: tpu7x:2x2x1
jax: 0.10.0
libtpu: 0.0.40
codegen_flags: <defaults>
</compile_context>

<pallas_src>
import functools

import jax
import jax.numpy as jnp
from jax import lax
from jax.experimental import pallas as pl
from jax.experimental.pallas import tpu as pltpu

EPS = 1e-6


# ---------------------------------------------------------------------------
# in-kernel math helpers (operate on VMEM-resident jnp arrays)
# ---------------------------------------------------------------------------
def _rmsnorm(x, w):
    # x: (M, D) fp32, w: (1, D) fp32.  Mean-of-squares kept fp32 (v5e-safe).
    var = jnp.mean(x * x, axis=-1, keepdims=True)
    return x * lax.rsqrt(var + EPS) * w


def _mha(q_src, kv_src, wo_ref, *, n_head, d_k, d_v, q_off, k_off, v_off, d_model):
    """Multi-head attention on VMEM-resident activations.

    q_src:  (Bb, Lq,  >= q_off + H*d_k) fp32 projected queries (scale in Wq)
    kv_src: (Bb, Lkv, >= v_off + H*d_v) fp32 projected keys/values
    wo_ref: (H, d_v, d_model) bf16 per-head output-projection weights

    Per-head lane slices feed rank-3 (batch-leading) einsums; the output
    projection is accumulated per head.  No stack/concat/transpose relayouts.
    """
    Bb, Lq = q_src.shape[0], q_src.shape[1]
    out = jnp.zeros((Bb * Lq, d_model), jnp.float32)
    for h in range(n_head):                     # unrolled; n_head is small & static
        qh = q_src[:, :, q_off + h * d_k:q_off + (h + 1) * d_k].astype(jnp.bfloat16)
        kh = kv_src[:, :, k_off + h * d_k:k_off + (h + 1) * d_k].astype(jnp.bfloat16)
        vh = kv_src[:, :, v_off + h * d_v:v_off + (h + 1) * d_v].astype(jnp.bfloat16)
        # scores: 1/sqrt(d_k) was folded into Wq at weight-prep time
        s = jnp.einsum("bqd,bkd->bqk", qh, kh, preferred_element_type=jnp.float32)
        s = s - jnp.max(s, axis=-1, keepdims=True)
        p = jnp.exp(s)
        # approx reciprocal runs on the EUP slot; ~1e-3 rel err (bf16-level noise)
        p = p * pl.reciprocal(jnp.sum(p, axis=-1, keepdims=True), approx=True)
        o = jnp.einsum("bqk,bkd->bqd", p.astype(jnp.bfloat16), vh,
                       preferred_element_type=jnp.float32)          # (Bb, Lq, d_v)
        out = out + jnp.dot(o.reshape(Bb * Lq, d_v).astype(jnp.bfloat16), wo_ref[h],
                            preferred_element_type=jnp.float32)
    return out                                                       # (Bb*Lq, D)


# ---------------------------------------------------------------------------
# Pallas kernel: one full InterBlock forward for a block of batch elements
# ---------------------------------------------------------------------------
def interblock_kernel(q_ref, kv_ref,
                      qn_w_ref, kvn_w_ref, ffnn_w_ref,
                      sa_wqkv_ref, sa_wo_ref,
                      ia_wq_ref, ia_wkv_ref, ia_wo_ref,
                      f_w13_ref, f_w2_ref,
                      out_ref, *, n_head, d_k, d_v):
    Bb, Lq, D = q_ref.shape
    Lkv = kv_ref.shape[1]
    H = n_head
    bf16 = jnp.bfloat16

    # Activations live as (rows, D) fp32; all reshapes below only split/merge
    # leading dims (no lane relayout).
    q = q_ref[...].astype(jnp.float32).reshape(Bb * Lq, D)
    kv = kv_ref[...].astype(jnp.float32).reshape(Bb * Lkv, D)
    qn_w, kvn_w, ffnn_w = qn_w_ref[...], kvn_w_ref[...], ffnn_w_ref[...]

    # ---- self-attention: out_q = q + MHA(_q, _q, _q) -----------------------
    _q = _rmsnorm(q, qn_w)
    qkv = jnp.dot(_q.astype(bf16), sa_wqkv_ref[...],            # fused Wq|Wk|Wv
                  preferred_element_type=jnp.float32)            # (Bb*Lq, 3*H*dk)
    qkv3 = qkv.reshape(Bb, Lq, 3 * H * d_k)
    out_q = q + _mha(qkv3, qkv3, sa_wo_ref, n_head=H, d_k=d_k, d_v=d_v,
                     q_off=0, k_off=H * d_k, v_off=2 * H * d_k, d_model=D)

    # ---- cross-attention: h = out_q + MHA(q_norm(out_q), kv_norm(kv), ...) -
    norm_q = _rmsnorm(out_q, qn_w)
    norm_kv = _rmsnorm(kv, kvn_w)
    qp = jnp.dot(norm_q.astype(bf16), ia_wq_ref[...],
                 preferred_element_type=jnp.float32)             # (Bb*Lq, H*dk)
    kvp = jnp.dot(norm_kv.astype(bf16), ia_wkv_ref[...],         # fused Wk|Wv
                  preferred_element_type=jnp.float32)            # (Bb*Lkv, 2*H*dk)
    qp3 = qp.reshape(Bb, Lq, H * d_k)
    kvp3 = kvp.reshape(Bb, Lkv, H * (d_k + d_v))
    h_res = out_q + _mha(qp3, kvp3, ia_wo_ref, n_head=H, d_k=d_k, d_v=d_v,
                         q_off=0, k_off=0, v_off=H * d_k, d_model=D)

    # ---- SwiGLU FFN: out = h + w2( silu(x w1) * (x w3) ),  x = ffn_norm(h) -
    xf = _rmsnorm(h_res, ffnn_w).astype(bf16)
    h13 = jnp.dot(xf, f_w13_ref[...], preferred_element_type=jnp.float32)  # w1|w3
    hidden = f_w13_ref.shape[1] // 2
    a = h13[:, :hidden]
    g = h13[:, hidden:]
    act = a * pl.reciprocal(1.0 + jnp.exp(-a), approx=True) * g            # SiLU*g
    ffn = jnp.dot(act.astype(bf16), f_w2_ref[...],
                  preferred_element_type=jnp.float32)

    out_ref[...] = (h_res + ffn).reshape(Bb, Lq, D).astype(out_ref.dtype)


# ---------------------------------------------------------------------------
# one-time host-side weight preparation (hoisted out of the forward pass)
# ---------------------------------------------------------------------------
def prepare_params(params, *, n_head):
    """Fuse Wq|Wk|Wv, Wk|Wv, w1|w3; fold 1/sqrt(d_k) into the query projections;
    lay out Wo per head as (H, d_v, D); cast all MXU weights to bf16."""
    D = params["sa_wq"].shape[0]
    d_k = params["sa_wq"].shape[1] // n_head
    d_v = params["sa_wv"].shape[1] // n_head
    assert d_k == d_v, "kernel assumes d_k == d_v (fused-QKV head offsets)"
    bf16 = jnp.bfloat16
    scale = 1.0 / (d_k ** 0.5)
    return {
        "q_norm_w": params["q_norm_w"].reshape(1, D).astype(jnp.float32),
        "kv_norm_w": params["kv_norm_w"].reshape(1, D).astype(jnp.float32),
        "ffn_norm_w": params["ffn_norm_w"].reshape(1, D).astype(jnp.float32),
        "sa_wqkv": jnp.concatenate(
            [params["sa_wq"] * scale, params["sa_wk"], params["sa_wv"]],
            axis=1).astype(bf16),
        "sa_wo": params["sa_wo"].reshape(n_head, d_v, D).astype(bf16),
        "ia_wq": (params["ia_wq"] * scale).astype(bf16),
        "ia_wkv": jnp.concatenate([params["ia_wk"], params["ia_wv"]],
                                  axis=1).astype(bf16),
        "ia_wo": params["ia_wo"].reshape(n_head, d_v, D).astype(bf16),
        "f_w13": jnp.concatenate([params["ffn_w1"], params["ffn_w3"]],
                                 axis=1).astype(bf16),
        "f_w2": params["ffn_w2"].astype(bf16),
    }


# ---------------------------------------------------------------------------
# wrapper
# ---------------------------------------------------------------------------
def interblock_forward(q, kv, prepared, *, n_head, mask=None, b_block=None):
    # TODO(synk): attention-mask path not implemented (mask=None only).
    assert mask is None
    B, Lq, D = q.shape
    _, Lkv, _ = kv.shape
    assert D % n_head == 0
    d_k = d_v = D // n_head

    if b_block is None:
        # Smallest batch block that still fills >=256 MXU rows per matmul
        # (v6e/v7x systolic depth; 128 suffices on v5e).  Keeps grid > 1 for
        # real batch sizes (v7x megacore split + DMA/compute overlap) while
        # collapsing to one step for tiny problems where the ~0.35us/step
        # pipeline overhead would dominate.
        b_block = B
        for cand in range(1, B):
            if B % cand == 0 and cand * Lq >= 256:
                b_block = cand
                break
    assert B % b_block == 0

    weights = [
        prepared["q_norm_w"], prepared["kv_norm_w"], prepared["ffn_norm_w"],
        prepared["sa_wqkv"], prepared["sa_wo"],
        prepared["ia_wq"], prepared["ia_wkv"], prepared["ia_wo"],
        prepared["f_w13"], prepared["f_w2"],
    ]

    # Right-size the VMEM request: resident weights + double-buffered q/kv/out
    # tiles + a rough fp32-intermediate allowance; x2 headroom, floored at 8 MiB
    # and capped at 64 MiB (v7x physical VMEM).
    itemsize = q.dtype.itemsize
    weight_bytes = sum(int(w.size) * w.dtype.itemsize for w in weights)
    io_bytes = 2 * itemsize * b_block * (2 * Lq * D + Lkv * D)
    act_bytes = 4 * b_block * (Lq * 16 * D + n_head * Lq * Lkv + Lkv * 4 * D)
    vmem_limit = int(min(64 * 2 ** 20,
                         max(8 * 2 ** 20,
                             2 * (weight_bytes + io_bytes + act_bytes))))

    in_specs = [
        pl.BlockSpec((b_block, Lq, D), lambda b: (b, 0, 0)),
        pl.BlockSpec((b_block, Lkv, D), lambda b: (b, 0, 0)),
    ] + [
        # Weights stay whole and VMEM-resident: no double-buffering of
        # constant-index blocks.  TODO(synk): for large d_model, tile
        # f_w13/f_w2 over the FFN hidden dim (extra "arbitrary" grid axis).
        pl.BlockSpec(memory_space=pltpu.MemorySpace.VMEM) for _ in weights
    ]

    kernel = functools.partial(interblock_kernel,
                               n_head=n_head, d_k=d_k, d_v=d_v)

    return pl.pallas_call(
        kernel,
        out_shape=jax.ShapeDtypeStruct((B, Lq, D), q.dtype),
        grid=(B // b_block,),
        in_specs=in_specs,
        out_specs=pl.BlockSpec((b_block, Lq, D), lambda b: (b, 0, 0)),
        compiler_params=pltpu.CompilerParams(
            dimension_semantics=("parallel",),   # batch steps may split across TCs
            vmem_limit_bytes=vmem_limit,
        ),
    )(q, kv, *weights)


# ---------------------------------------------------------------------------
# parameter init + pure-JAX fp32 reference (sanity check)
# ---------------------------------------------------------------------------
def init_params(key, d_model, n_head):
    d_k = d_v = d_model // n_head
    hidden = 4 * d_model
    ks = jax.random.split(key, 14)

    def lin(k, fan_in, fan_out):
        return (jax.random.normal(k, (fan_in, fan_out), jnp.float32)
                / jnp.sqrt(jnp.float32(fan_in)))

    def norm_w(k):
        return 1.0 + 0.1 * jax.random.normal(k, (1, d_model), jnp.float32)

    return {
        "q_norm_w": norm_w(ks[11]),
        "kv_norm_w": norm_w(ks[12]),
        "ffn_norm_w": norm_w(ks[13]),
        "sa_wq": lin(ks[0], d_model, n_head * d_k),
        "sa_wk": lin(ks[1], d_model, n_head * d_k),
        "sa_wv": lin(ks[2], d_model, n_head * d_v),
        "sa_wo": lin(ks[3], n_head * d_v, d_model),
        "ia_wq": lin(ks[4], d_model, n_head * d_k),
        "ia_wk": lin(ks[5], d_model, n_head * d_k),
        "ia_wv": lin(ks[6], d_model, n_head * d_v),
        "ia_wo": lin(ks[7], n_head * d_v, d_model),
        "ffn_w1": lin(ks[8], d_model, hidden),
        "ffn_w3": lin(ks[9], d_model, hidden),
        "ffn_w2": lin(ks[10], hidden, d_model),
    }


def interblock_reference(q, kv, params, *, n_head):
    D = q.shape[-1]
    d_k = d_v = D // n_head

    def rmsnorm(x, w):
        var = jnp.mean(x * x, axis=-1, keepdims=True)
        return x * lax.rsqrt(var + EPS) * w.reshape(-1)

    def mha(xq, xkv, wq, wk, wv, wo):
        B, Lq, _ = xq.shape
        Lkv = xkv.shape[1]
        qp = (xq @ wq).reshape(B, Lq, n_head, d_k).transpose(0, 2, 1, 3)
        kp = (xkv @ wk).reshape(B, Lkv, n_head, d_k).transpose(0, 2, 1, 3)
        vp = (xkv @ wv).reshape(B, Lkv, n_head, d_v).transpose(0, 2, 1, 3)
        s = jnp.einsum("bhqd,bhkd->bhqk", qp, kp) / (d_k ** 0.5)
        p = jax.nn.softmax(s, axis=-1)
        o = jnp.einsum("bhqk,bhkd->bhqd", p, vp)
        o = o.transpose(0, 2, 1, 3).reshape(B, Lq, n_head * d_v)
        return o @ wo

    _q = rmsnorm(q, params["q_norm_w"])
    out_q = q + mha(_q, _q, params["sa_wq"], params["sa_wk"], params["sa_wv"],
                    params["sa_wo"])
    norm_q = rmsnorm(out_q, params["q_norm_w"])
    norm_kv = rmsnorm(kv, params["kv_norm_w"])
    h = out_q + mha(norm_q, norm_kv, params["ia_wq"], params["ia_wk"],
                    params["ia_wv"], params["ia_wo"])
    x = rmsnorm(h, params["ffn_norm_w"])
    a = x @ params["ffn_w1"]
    g = x @ params["ffn_w3"]
    return h + (a * jax.nn.sigmoid(a) * g) @ params["ffn_w2"]


if __name__ == "__main__":
    # config: down_dim = 32, down_n_head = 4
    B, Lq, Lkv, D, H = 2, 8, 16, 32, 4

    key = jax.random.PRNGKey(0)
    kq, kkv, kp = jax.random.split(key, 3)
    q = jax.random.normal(kq, (B, Lq, D), jnp.float32)
    kv = jax.random.normal(kkv, (B, Lkv, D), jnp.float32)
    params = init_params(kp, D, H)
    prepared = prepare_params(params, n_head=H)   # one-time weight prep (hoisted)

    out = interblock_forward(q, kv, prepared, n_head=H, mask=None)
    out = jax.block_until_ready(out)
    assert out.shape == (B, Lq, D)
    assert bool(jnp.isfinite(out).all())

    # loose tolerance: bf16 MXU operands + approx EUP reciprocals vs fp32 reference
    ref = interblock_reference(q, kv, params, n_head=H)
    max_err = float(jnp.max(jnp.abs(out - ref)))
    assert bool(jnp.allclose(out, ref, rtol=1e-1, atol=1e-1)), max_err

    print("KERNEL_OK")
</pallas_src>

<mosaic_0001>
module attributes {stable_mosaic.version = 11 : i64} {
  func.func @interblock_kernel(%arg0: i32, %arg1: memref<2x8x32xf32, #tpu.memory_space<vmem>>, %arg2: memref<2x16x32xf32, #tpu.memory_space<vmem>>, %arg3: memref<1x32xf32, #tpu.memory_space<vmem>>, %arg4: memref<1x32xf32, #tpu.memory_space<vmem>>, %arg5: memref<1x32xf32, #tpu.memory_space<vmem>>, %arg6: memref<32x96xbf16, #tpu.memory_space<vmem>>, %arg7: memref<4x8x32xbf16, #tpu.memory_space<vmem>>, %arg8: memref<32x32xbf16, #tpu.memory_space<vmem>>, %arg9: memref<32x64xbf16, #tpu.memory_space<vmem>>, %arg10: memref<4x8x32xbf16, #tpu.memory_space<vmem>>, %arg11: memref<32x256xbf16, #tpu.memory_space<vmem>>, %arg12: memref<128x32xbf16, #tpu.memory_space<vmem>>, %arg13: memref<2x8x32xf32, #tpu.memory_space<vmem>>) attributes {dimension_semantics = [#tpu.dimension_semantics<parallel>], iteration_bounds = array<i64: 1>, scalar_prefetch = 0 : i64, scratch_operands = 0 : i64, tpu.core_type = #tpu.core_type<tc>, window_params = [{transform_indices = @transform_0, window_bounds = array<i64: 2, 8, 32>}, {transform_indices = @transform_1, window_bounds = array<i64: 2, 16, 32>}, {pipeline_mode = #tpu.pipeline_mode<synchronous>, transform_indices = @transform_2, window_bounds = array<i64: 1, 32>}, {pipeline_mode = #tpu.pipeline_mode<synchronous>, transform_indices = @transform_3, window_bounds = array<i64: 1, 32>}, {pipeline_mode = #tpu.pipeline_mode<synchronous>, transform_indices = @transform_4, window_bounds = array<i64: 1, 32>}, {pipeline_mode = #tpu.pipeline_mode<synchronous>, transform_indices = @transform_5, window_bounds = array<i64: 32, 96>}, {pipeline_mode = #tpu.pipeline_mode<synchronous>, transform_indices = @transform_6, window_bounds = array<i64: 4, 8, 32>}, {pipeline_mode = #tpu.pipeline_mode<synchronous>, transform_indices = @transform_7, window_bounds = array<i64: 32, 32>}, {pipeline_mode = #tpu.pipeline_mode<synchronous>, transform_indices = @transform_8, window_bounds = array<i64: 32, 64>}, {pipeline_mode = #tpu.pipeline_mode<synchronous>, transform_indices = @transform_9, window_bounds = array<i64: 4, 8, 32>}, {pipeline_mode = #tpu.pipeline_mode<synchronous>, transform_indices = @transform_10, window_bounds = array<i64: 32, 256>}, {pipeline_mode = #tpu.pipeline_mode<synchronous>, transform_indices = @transform_11, window_bounds = array<i64: 128, 32>}, {transform_indices = @transform_12, window_bounds = array<i64: 2, 8, 32>}]} {
    %c0 = arith.constant 0 : index
    %c0_0 = arith.constant 0 : index
    %c0_1 = arith.constant 0 : index
    %0 = vector.load %arg1[%c0, %c0_0, %c0_1] : memref<2x8x32xf32, #tpu.memory_space<vmem>>, vector<2x8x32xf32>
    %1 = vector.shape_cast %0 : vector<2x8x32xf32> to vector<16x32xf32>
    %c0_2 = arith.constant 0 : index
    %c0_3 = arith.constant 0 : index
    %c0_4 = arith.constant 0 : index
    %2 = vector.load %arg2[%c0_2, %c0_3, %c0_4] : memref<2x16x32xf32, #tpu.memory_space<vmem>>, vector<2x16x32xf32>
    %3 = vector.shape_cast %2 : vector<2x16x32xf32> to vector<32x32xf32>
    %c0_5 = arith.constant 0 : index
    %c0_6 = arith.constant 0 : index
    %4 = vector.load %arg3[%c0_5, %c0_6] : memref<1x32xf32, #tpu.memory_space<vmem>>, vector<1x32xf32>
    %c0_7 = arith.constant 0 : index
    %c0_8 = arith.constant 0 : index
    %5 = vector.load %arg4[%c0_7, %c0_8] : memref<1x32xf32, #tpu.memory_space<vmem>>, vector<1x32xf32>
    %c0_9 = arith.constant 0 : index
    %c0_10 = arith.constant 0 : index
    %6 = vector.load %arg5[%c0_9, %c0_10] : memref<1x32xf32, #tpu.memory_space<vmem>>, vector<1x32xf32>
    %7 = arith.mulf %1, %1 : vector<16x32xf32>
    %cst = arith.constant dense<0.000000e+00> : vector<16xf32>
    %8 = vector.multi_reduction <add>, %7, %cst [1] : vector<16x32xf32> to vector<16xf32>
    %9 = vector.shape_cast %8 : vector<16xf32> to vector<16x1xf32>
    %cst_11 = arith.constant 3.200000e+01 : f32
    %10 = vector.broadcast %cst_11 : f32 to vector<16x1xf32>
    %11 = arith.divf %9, %10 : vector<16x1xf32>
    %cst_12 = arith.constant 9.99999997E-7 : f32
    %12 = vector.broadcast %cst_12 : f32 to vector<16x1xf32>
    %13 = arith.addf %11, %12 : vector<16x1xf32>
    %14 = math.rsqrt %13 : vector<16x1xf32>
    %15 = vector.broadcast %14 : vector<16x1xf32> to vector<16x32xf32>
    %16 = arith.mulf %1, %15 : vector<16x32xf32>
    %17 = vector.broadcast %4 : vector<1x32xf32> to vector<16x32xf32>
    %18 = arith.mulf %16, %17 : vector<16x32xf32>
    %19 = arith.truncf %18 : vector<16x32xf32> to vector<16x32xbf16>
    %c0_13 = arith.constant 0 : index
    %c0_14 = arith.constant 0 : index
    %20 = vector.load %arg6[%c0_13, %c0_14] : memref<32x96xbf16, #tpu.memory_space<vmem>>, vector<32x96xbf16>
    %cst_15 = arith.constant dense<0.000000e+00> : vector<16x96xf32>
    %21 = tpu.matmul %19, %20, %cst_15 {dimension_numbers = #tpu.dot_dimension_numbers<[1], [0], [0], [1], [0, 0, 1, 1], [], []>} : vector<16x32xbf16>, vector<32x96xbf16>, vector<16x96xf32> -> vector<16x96xf32>
    %22 = vector.shape_cast %21 : vector<16x96xf32> to vector<2x8x96xf32>
    %cst_16 = arith.constant 0.000000e+00 : f32
    %23 = vector.broadcast %cst_16 : f32 to vector<16x32xf32>
    %24 = vector.extract_strided_slice %22 {offsets = [0, 0, 0], sizes = [2, 8, 8], strides = [1, 1, 1]} : vector<2x8x96xf32> to vector<2x8x8xf32>
    %25 = arith.truncf %24 : vector<2x8x8xf32> to vector<2x8x8xbf16>
    %26 = vector.extract_strided_slice %22 {offsets = [0, 0, 32], sizes = [2, 8, 8], strides = [1, 1, 1]} : vector<2x8x96xf32> to vector<2x8x8xf32>
    %27 = arith.truncf %26 : vector<2x8x8xf32> to vector<2x8x8xbf16>
    %28 = vector.extract_strided_slice %22 {offsets = [0, 0, 64], sizes = [2, 8, 8], strides = [1, 1, 1]} : vector<2x8x96xf32> to vector<2x8x8xf32>
    %29 = arith.truncf %28 : vector<2x8x8xf32> to vector<2x8x8xbf16>
    "tpu.trace_start"() <{level = 10 : i32, message = "bqd,bkd->bqk"}> : () -> ()
    %cst_17 = arith.constant dense<0.000000e+00> : vector<2x8x8xf32>
    %30 = tpu.matmul %25, %27, %cst_17 {dimension_numbers = #tpu.dot_dimension_numbers<[2], [2], [1], [1], [0, 0, 0, 1, 1, 1], [0], [0]>} : vector<2x8x8xbf16>, vector<2x8x8xbf16>, vector<2x8x8xf32> -> vector<2x8x8xf32>
    "tpu.trace_stop"() : () -> ()
    %cst_18 = arith.constant dense<0xFF800000> : vector<2x8xf32>
    %31 = vector.multi_reduction <maximumf>, %30, %cst_18 [2] : vector<2x8x8xf32> to vector<2x8xf32>
    %32 = vector.shape_cast %31 : vector<2x8xf32> to vector<2x8x1xf32>
    %33 = vector.broadcast %32 : vector<2x8x1xf32> to vector<2x8x8xf32>
    %34 = arith.subf %30, %33 : vector<2x8x8xf32>
    %35 = math.exp %34 : vector<2x8x8xf32>
    %cst_19 = arith.constant dense<0.000000e+00> : vector<2x8xf32>
    %36 = vector.multi_reduction <add>, %35, %cst_19 [2] : vector<2x8x8xf32> to vector<2x8xf32>
    %37 = vector.shape_cast %36 : vector<2x8xf32> to vector<2x8x1xf32>
    %38 = tpu.reciprocal %37 {approx = true} : vector<2x8x1xf32> -> vector<2x8x1xf32>
    %39 = vector.broadcast %38 : vector<2x8x1xf32> to vector<2x8x8xf32>
    %40 = arith.mulf %35, %39 : vector<2x8x8xf32>
    %41 = arith.truncf %40 : vector<2x8x8xf32> to vector<2x8x8xbf16>
    "tpu.trace_start"() <{level = 10 : i32, message = "bqk,bkd->bqd"}> : () -> ()
    %cst_20 = arith.constant dense<0.000000e+00> : vector<2x8x8xf32>
    %42 = tpu.matmul %41, %29, %cst_20 {dimension_numbers = #tpu.dot_dimension_numbers<[2], [1], [1], [2], [0, 0, 0, 1, 1, 2], [0], [0]>} : vector<2x8x8xbf16>, vector<2x8x8xbf16>, vector<2x8x8xf32> -> vector<2x8x8xf32>
    "tpu.trace_stop"() : () -> ()
    %43 = vector.shape_cast %42 : vector<2x8x8xf32> to vector<16x8xf32>
    %44 = arith.truncf %43 : vector<16x8xf32> to vector<16x8xbf16>
    %c0_21 = arith.constant 0 : index
    %c0_22 = arith.constant 0 : index
    %c0_23 = arith.constant 0 : index
    %45 = vector.load %arg7[%c0_21, %c0_22, %c0_23] : memref<4x8x32xbf16, #tpu.memory_space<vmem>>, vector<1x8x32xbf16>
    %46 = vector.shape_cast %45 : vector<1x8x32xbf16> to vector<8x32xbf16>
    %cst_24 = arith.constant dense<0.000000e+00> : vector<16x32xf32>
    %47 = tpu.matmul %44, %46, %cst_24 {dimension_numbers = #tpu.dot_dimension_numbers<[1], [0], [0], [1], [0, 0, 1, 1], [], []>} : vector<16x8xbf16>, vector<8x32xbf16>, vector<16x32xf32> -> vector<16x32xf32>
    %48 = arith.addf %23, %47 : vector<16x32xf32>
    %49 = vector.extract_strided_slice %22 {offsets = [0, 0, 8], sizes = [2, 8, 8], strides = [1, 1, 1]} : vector<2x8x96xf32> to vector<2x8x8xf32>
    %50 = arith.truncf %49 : vector<2x8x8xf32> to vector<2x8x8xbf16>
    %51 = vector.extract_strided_slice %22 {offsets = [0, 0, 40], sizes = [2, 8, 8], strides = [1, 1, 1]} : vector<2x8x96xf32> to vector<2x8x8xf32>
    %52 = arith.truncf %51 : vector<2x8x8xf32> to vector<2x8x8xbf16>
    %53 = vector.extract_strided_slice %22 {offsets = [0, 0, 72], sizes = [2, 8, 8], strides = [1, 1, 1]} : vector<2x8x96xf32> to vector<2x8x8xf32>
    %54 = arith.truncf %53 : vector<2x8x8xf32> to vector<2x8x8xbf16>
    "tpu.trace_start"() <{level = 10 : i32, message = "bqd,bkd->bqk"}> : () -> ()
    %cst_25 = arith.constant dense<0.000000e+00> : vector<2x8x8xf32>
    %55 = tpu.matmul %50, %52, %cst_25 {dimension_numbers = #tpu.dot_dimension_numbers<[2], [2], [1], [1], [0, 0, 0, 1, 1, 1], [0], [0]>} : vector<2x8x8xbf16>, vector<2x8x8xbf16>, vector<2x8x8xf32> -> vector<2x8x8xf32>
    "tpu.trace_stop"() : () -> ()
    %cst_26 = arith.constant dense<0xFF800000> : vector<2x8xf32>
    %56 = vector.multi_reduction <maximumf>, %55, %cst_26 [2] : vector<2x8x8xf32> to vector<2x8xf32>
    %57 = vector.shape_cast %56 : vector<2x8xf32> to vector<2x8x1xf32>
    %58 = vector.broadcast %57 : vector<2x8x1xf32> to vector<2x8x8xf32>
    %59 = arith.subf %55, %58 : vector<2x8x8xf32>
    %60 = math.exp %59 : vector<2x8x8xf32>
    %cst_27 = arith.constant dense<0.000000e+00> : vector<2x8xf32>
    %61 = vector.multi_reduction <add>, %60, %cst_27 [2] : vector<2x8x8xf32> to vector<2x8xf32>
    %62 = vector.shape_cast %61 : vector<2x8xf32> to vector<2x8x1xf32>
    %63 = tpu.reciprocal %62 {approx = true} : vector<2x8x1xf32> -> vector<2x8x1xf32>
    %64 = vector.broadcast %63 : vector<2x8x1xf32> to vector<2x8x8xf32>
    %65 = arith.mulf %60, %64 : vector<2x8x8xf32>
    %66 = arith.truncf %65 : vector<2x8x8xf32> to vector<2x8x8xbf16>
    "tpu.trace_start"() <{level = 10 : i32, message = "bqk,bkd->bqd"}> : () -> ()
    %cst_28 = arith.constant dense<0.000000e+00> : vector<2x8x8xf32>
    %67 = tpu.matmul %66, %54, %cst_28 {dimension_numbers = #tpu.dot_dimension_numbers<[2], [1], [1], [2], [0, 0, 0, 1, 1, 2], [0], [0]>} : vector<2x8x8xbf16>, vector<2x8x8xbf16>, vector<2x8x8xf32> -> vector<2x8x8xf32>
    "tpu.trace_stop"() : () -> ()
    %68 = vector.shape_cast %67 : vector<2x8x8xf32> to vector<16x8xf32>
    %69 = arith.truncf %68 : vector<16x8xf32> to vector<16x8xbf16>
    %c1 = arith.constant 1 : index
    %c0_29 = arith.constant 0 : index
    %c0_30 = arith.constant 0 : index
    %70 = vector.load %arg7[%c1, %c0_29, %c0_30] : memref<4x8x32xbf16, #tpu.memory_space<vmem>>, vector<1x8x32xbf16>
    %71 = vector.shape_cast %70 : vector<1x8x32xbf16> to vector<8x32xbf16>
    %cst_31 = arith.constant dense<0.000000e+00> : vector<16x32xf32>
    %72 = tpu.matmul %69, %71, %cst_31 {dimension_numbers = #tpu.dot_dimension_numbers<[1], [0], [0], [1], [0, 0, 1, 1], [], []>} : vector<16x8xbf16>, vector<8x32xbf16>, vector<16x32xf32> -> vector<16x32xf32>
    %73 = arith.addf %48, %72 : vector<16x32xf32>
    %74 = vector.extract_strided_slice %22 {offsets = [0, 0, 16], sizes = [2, 8, 8], strides = [1, 1, 1]} : vector<2x8x96xf32> to vector<2x8x8xf32>
    %75 = arith.truncf %74 : vector<2x8x8xf32> to vector<2x8x8xbf16>
    %76 = vector.extract_strided_slice %22 {offsets = [0, 0, 48], sizes = [2, 8, 8], strides = [1, 1, 1]} : vector<2x8x96xf32> to vector<2x8x8xf32>
    %77 = arith.truncf %76 : vector<2x8x8xf32> to vector<2x8x8xbf16>
    %78 = vector.extract_strided_slice %22 {offsets = [0, 0, 80], sizes = [2, 8, 8], strides = [1, 1, 1]} : vector<2x8x96xf32> to vector<2x8x8xf32>
    %79 = arith.truncf %78 : vector<2x8x8xf32> to vector<2x8x8xbf16>
    "tpu.trace_start"() <{level = 10 : i32, message = "bqd,bkd->bqk"}> : () -> ()
    %cst_32 = arith.constant dense<0.000000e+00> : vector<2x8x8xf32>
    %80 = tpu.matmul %75, %77, %cst_32 {dimension_numbers = #tpu.dot_dimension_numbers<[2], [2], [1], [1], [0, 0, 0, 1, 1, 1], [0], [0]>} : vector<2x8x8xbf16>, vector<2x8x8xbf16>, vector<2x8x8xf32> -> vector<2x8x8xf32>
    "tpu.trace_stop"() : () -> ()
    %cst_33 = arith.constant dense<0xFF800000> : vector<2x8xf32>
    %81 = vector.multi_reduction <maximumf>, %80, %cst_33 [2] : vector<2x8x8xf32> to vector<2x8xf32>
    %82 = vector.shape_cast %81 : vector<2x8xf32> to vector<2x8x1xf32>
    %83 = vector.broadcast %82 : vector<2x8x1xf32> to vector<2x8x8xf32>
    %84 = arith.subf %80, %83 : vector<2x8x8xf32>
    %85 = math.exp %84 : vector<2x8x8xf32>
    %cst_34 = arith.constant dense<0.000000e+00> : vector<2x8xf32>
    %86 = vector.multi_reduction <add>, %85, %cst_34 [2] : vector<2x8x8xf32> to vector<2x8xf32>
    %87 = vector.shape_cast %86 : vector<2x8xf32> to vector<2x8x1xf32>
    %88 = tpu.reciprocal %87 {approx = true} : vector<2x8x1xf32> -> vector<2x8x1xf32>
    %89 = vector.broadcast %88 : vector<2x8x1xf32> to vector<2x8x8xf32>
    %90 = arith.mulf %85, %89 : vector<2x8x8xf32>
    %91 = arith.truncf %90 : vector<2x8x8xf32> to vector<2x8x8xbf16>
    "tpu.trace_start"() <{level = 10 : i32, message = "bqk,bkd->bqd"}> : () -> ()
    %cst_35 = arith.constant dense<0.000000e+00> : vector<2x8x8xf32>
    %92 = tpu.matmul %91, %79, %cst_35 {dimension_numbers = #tpu.dot_dimension_numbers<[2], [1], [1], [2], [0, 0, 0, 1, 1, 2], [0], [0]>} : vector<2x8x8xbf16>, vector<2x8x8xbf16>, vector<2x8x8xf32> -> vector<2x8x8xf32>
    "tpu.trace_stop"() : () -> ()
    %93 = vector.shape_cast %92 : vector<2x8x8xf32> to vector<16x8xf32>
    %94 = arith.truncf %93 : vector<16x8xf32> to vector<16x8xbf16>
    %c2 = arith.constant 2 : index
    %c0_36 = arith.constant 0 : index
    %c0_37 = arith.constant 0 : index
    %95 = vector.load %arg7[%c2, %c0_36, %c0_37] : memref<4x8x32xbf16, #tpu.memory_space<vmem>>, vector<1x8x32xbf16>
    %96 = vector.shape_cast %95 : vector<1x8x32xbf16> to vector<8x32xbf16>
    %cst_38 = arith.constant dense<0.000000e+00> : vector<16x32xf32>
    %97 = tpu.matmul %94, %96, %cst_38 {dimension_numbers = #tpu.dot_dimension_numbers<[1], [0], [0], [1], [0, 0, 1, 1], [], []>} : vector<16x8xbf16>, vector<8x32xbf16>, vector<16x32xf32> -> vector<16x32xf32>
    %98 = arith.addf %73, %97 : vector<16x32xf32>
    %99 = vector.extract_strided_slice %22 {offsets = [0, 0, 24], sizes = [2, 8, 8], strides = [1, 1, 1]} : vector<2x8x96xf32> to vector<2x8x8xf32>
    %100 = arith.truncf %99 : vector<2x8x8xf32> to vector<2x8x8xbf16>
    %101 = vector.extract_strided_slice %22 {offsets = [0, 0, 56], sizes = [2, 8, 8], strides = [1, 1, 1]} : vector<2x8x96xf32> to vector<2x8x8xf32>
    %102 = arith.truncf %101 : vector<2x8x8xf32> to vector<2x8x8xbf16>
    %103 = vector.extract_strided_slice %22 {offsets = [0, 0, 88], sizes = [2, 8, 8], strides = [1, 1, 1]} : vector<2x8x96xf32> to vector<2x8x8xf32>
    %104 = arith.truncf %103 : vector<2x8x8xf32> to vector<2x8x8xbf16>
    "tpu.trace_start"() <{level = 10 : i32, message = "bqd,bkd->bqk"}> : () -> ()
    %cst_39 = arith.constant dense<0.000000e+00> : vector<2x8x8xf32>
    %105 = tpu.matmul %100, %102, %cst_39 {dimension_numbers = #tpu.dot_dimension_numbers<[2], [2], [1], [1], [0, 0, 0, 1, 1, 1], [0], [0]>} : vector<2x8x8xbf16>, vector<2x8x8xbf16>, vector<2x8x8xf32> -> vector<2x8x8xf32>
    "tpu.trace_stop"() : () -> ()
    %cst_40 = arith.constant dense<0xFF800000> : vector<2x8xf32>
    %106 = vector.multi_reduction <maximumf>, %105, %cst_40 [2] : vector<2x8x8xf32> to vector<2x8xf32>
    %107 = vector.shape_cast %106 : vector<2x8xf32> to vector<2x8x1xf32>
    %108 = vector.broadcast %107 : vector<2x8x1xf32> to vector<2x8x8xf32>
    %109 = arith.subf %105, %108 : vector<2x8x8xf32>
    %110 = math.exp %109 : vector<2x8x8xf32>
    %cst_41 = arith.constant dense<0.000000e+00> : vector<2x8xf32>
    %111 = vector.multi_reduction <add>, %110, %cst_41 [2] : vector<2x8x8xf32> to vector<2x8xf32>
    %112 = vector.shape_cast %111 : vector<2x8xf32> to vector<2x8x1xf32>
    %113 = tpu.reciprocal %112 {approx = true} : vector<2x8x1xf32> -> vector<2x8x1xf32>
    %114 = vector.broadcast %113 : vector<2x8x1xf32> to vector<2x8x8xf32>
    %115 = arith.mulf %110, %114 : vector<2x8x8xf32>
    %116 = arith.truncf %115 : vector<2x8x8xf32> to vector<2x8x8xbf16>
    "tpu.trace_start"() <{level = 10 : i32, message = "bqk,bkd->bqd"}> : () -> ()
    %cst_42 = arith.constant dense<0.000000e+00> : vector<2x8x8xf32>
    %117 = tpu.matmul %116, %104, %cst_42 {dimension_numbers = #tpu.dot_dimension_numbers<[2], [1], [1], [2], [0, 0, 0, 1, 1, 2], [0], [0]>} : vector<2x8x8xbf16>, vector<2x8x8xbf16>, vector<2x8x8xf32> -> vector<2x8x8xf32>
    "tpu.trace_stop"() : () -> ()
    %118 = vector.shape_cast %117 : vector<2x8x8xf32> to vector<16x8xf32>
    %119 = arith.truncf %118 : vector<16x8xf32> to vector<16x8xbf16>
    %c3 = arith.constant 3 : index
    %c0_43 = arith.constant 0 : index
    %c0_44 = arith.constant 0 : index
    %120 = vector.load %arg7[%c3, %c0_43, %c0_44] : memref<4x8x32xbf16, #tpu.memory_space<vmem>>, vector<1x8x32xbf16>
    %121 = vector.shape_cast %120 : vector<1x8x32xbf16> to vector<8x32xbf16>
    %cst_45 = arith.constant dense<0.000000e+00> : vector<16x32xf32>
    %122 = tpu.matmul %119, %121, %cst_45 {dimension_numbers = #tpu.dot_dimension_numbers<[1], [0], [0], [1], [0, 0, 1, 1], [], []>} : vector<16x8xbf16>, vector<8x32xbf16>, vector<16x32xf32> -> vector<16x32xf32>
    %123 = arith.addf %98, %122 : vector<16x32xf32>
    %124 = arith.addf %1, %123 : vector<16x32xf32>
    %125 = arith.mulf %124, %124 : vector<16x32xf32>
    %cst_46 = arith.constant dense<0.000000e+00> : vector<16xf32>
    %126 = vector.multi_reduction <add>, %125, %cst_46 [1] : vector<16x32xf32> to vector<16xf32>
    %127 = vector.shape_cast %126 : vector<16xf32> to vector<16x1xf32>
    %cst_47 = arith.constant 3.200000e+01 : f32
    %128 = vector.broadcast %cst_47 : f32 to vector<16x1xf32>
    %129 = arith.divf %127, %128 : vector<16x1xf32>
    %cst_48 = arith.constant 9.99999997E-7 : f32
    %130 = vector.broadcast %cst_48 : f32 to vector<16x1xf32>
    %131 = arith.addf %129, %130 : vector<16x1xf32>
    %132 = math.rsqrt %131 : vector<16x1xf32>
    %133 = vector.broadcast %132 : vector<16x1xf32> to vector<16x32xf32>
    %134 = arith.mulf %124, %133 : vector<16x32xf32>
    %135 = vector.broadcast %4 : vector<1x32xf32> to vector<16x32xf32>
    %136 = arith.mulf %134, %135 : vector<16x32xf32>
    %137 = arith.mulf %3, %3 : vector<32x32xf32>
    %cst_49 = arith.constant dense<0.000000e+00> : vector<32xf32>
    %138 = vector.multi_reduction <add>, %137, %cst_49 [1] : vector<32x32xf32> to vector<32xf32>
    %139 = vector.shape_cast %138 : vector<32xf32> to vector<32x1xf32>
    %cst_50 = arith.constant 3.200000e+01 : f32
    %140 = vector.broadcast %cst_50 : f32 to vector<32x1xf32>
    %141 = arith.divf %139, %140 : vector<32x1xf32>
    %cst_51 = arith.constant 9.99999997E-7 : f32
    %142 = vector.broadcast %cst_51 : f32 to vector<32x1xf32>
    %143 = arith.addf %141, %142 : vector<32x1xf32>
    %144 = math.rsqrt %143 : vector<32x1xf32>
    %145 = vector.broadcast %144 : vector<32x1xf32> to vector<32x32xf32>
    %146 = arith.mulf %3, %145 : vector<32x32xf32>
    %147 = vector.broadcast %5 : vector<1x32xf32> to vector<32x32xf32>
    %148 = arith.mulf %146, %147 : vector<32x32xf32>
    %149 = arith.truncf %136 : vector<16x32xf32> to vector<16x32xbf16>
    %c0_52 = arith.constant 0 : index
    %c0_53 = arith.constant 0 : index
    %150 = vector.load %arg8[%c0_52, %c0_53] : memref<32x32xbf16, #tpu.memory_space<vmem>>, vector<32x32xbf16>
    %cst_54 = arith.constant dense<0.000000e+00> : vector<16x32xf32>
    %151 = tpu.matmul %149, %150, %cst_54 {dimension_numbers = #tpu.dot_dimension_numbers<[1], [0], [0], [1], [0, 0, 1, 1], [], []>} : vector<16x32xbf16>, vector<32x32xbf16>, vector<16x32xf32> -> vector<16x32xf32>
    %152 = arith.truncf %148 : vector<32x32xf32> to vector<32x32xbf16>
    %c0_55 = arith.constant 0 : index
    %c0_56 = arith.constant 0 : index
    %153 = vector.load %arg9[%c0_55, %c0_56] : memref<32x64xbf16, #tpu.memory_space<vmem>>, vector<32x64xbf16>
    %cst_57 = arith.constant dense<0.000000e+00> : vector<32x64xf32>
    %154 = tpu.matmul %152, %153, %cst_57 {dimension_numbers = #tpu.dot_dimension_numbers<[1], [0], [0], [1], [0, 0, 1, 1], [], []>} : vector<32x32xbf16>, vector<32x64xbf16>, vector<32x64xf32> -> vector<32x64xf32>
    %155 = vector.shape_cast %151 : vector<16x32xf32> to vector<2x8x32xf32>
    %156 = vector.shape_cast %154 : vector<32x64xf32> to vector<2x16x64xf32>
    %cst_58 = arith.constant 0.000000e+00 : f32
    %157 = vector.broadcast %cst_58 : f32 to vector<16x32xf32>
    %158 = vector.extract_strided_slice %155 {offsets = [0, 0, 0], sizes = [2, 8, 8], strides = [1, 1, 1]} : vector<2x8x32xf32> to vector<2x8x8xf32>
    %159 = arith.truncf %158 : vector<2x8x8xf32> to vector<2x8x8xbf16>
    %160 = vector.extract_strided_slice %156 {offsets = [0, 0, 0], sizes = [2, 16, 8], strides = [1, 1, 1]} : vector<2x16x64xf32> to vector<2x16x8xf32>
    %161 = arith.truncf %160 : vector<2x16x8xf32> to vector<2x16x8xbf16>
    %162 = vector.extract_strided_slice %156 {offsets = [0, 0, 32], sizes = [2, 16, 8], strides = [1, 1, 1]} : vector<2x16x64xf32> to vector<2x16x8xf32>
    %163 = arith.truncf %162 : vector<2x16x8xf32> to vector<2x16x8xbf16>
    "tpu.trace_start"() <{level = 10 : i32, message = "bqd,bkd->bqk"}> : () -> ()
    %cst_59 = arith.constant dense<0.000000e+00> : vector<2x8x16xf32>
    %164 = tpu.matmul %159, %161, %cst_59 {dimension_numbers = #tpu.dot_dimension_numbers<[2], [2], [1], [1], [0, 0, 0, 1, 1, 1], [0], [0]>} : vector<2x8x8xbf16>, vector<2x16x8xbf16>, vector<2x8x16xf32> -> vector<2x8x16xf32>
    "tpu.trace_stop"() : () -> ()
    %cst_60 = arith.constant dense<0xFF800000> : vector<2x8xf32>
    %165 = vector.multi_reduction <maximumf>, %164, %cst_60 [2] : vector<2x8x16xf32> to vector<2x8xf32>
    %166 = vector.shape_cast %165 : vector<2x8xf32> to vector<2x8x1xf32>
    %167 = vector.broadcast %166 : vector<2x8x1xf32> to vector<2x8x16xf32>
    %168 = arith.subf %164, %167 : vector<2x8x16xf32>
    %169 = math.exp %168 : vector<2x8x16xf32>
    %cst_61 = arith.constant dense<0.000000e+00> : vector<2x8xf32>
    %170 = vector.multi_reduction <add>, %169, %cst_61 [2] : vector<2x8x16xf32> to vector<2x8xf32>
    %171 = vector.shape_cast %170 : vector<2x8xf32> to vector<2x8x1xf32>
    %172 = tpu.reciprocal %171 {approx = true} : vector<2x8x1xf32> -> vector<2x8x1xf32>
    %173 = vector.broadcast %172 : vector<2x8x1xf32> to vector<2x8x16xf32>
    %174 = arith.mulf %169, %173 : vector<2x8x16xf32>
    %175 = arith.truncf %174 : vector<2x8x16xf32> to vector<2x8x16xbf16>
    "tpu.trace_start"() <{level = 10 : i32, message = "bqk,bkd->bqd"}> : () -> ()
    %cst_62 = arith.constant dense<0.000000e+00> : vector<2x8x8xf32>
    %176 = tpu.matmul %175, %163, %cst_62 {dimension_numbers = #tpu.dot_dimension_numbers<[2], [1], [1], [2], [0, 0, 0, 1, 1, 2], [0], [0]>} : vector<2x8x16xbf16>, vector<2x16x8xbf16>, vector<2x8x8xf32> -> vector<2x8x8xf32>
    "tpu.trace_stop"() : () -> ()
    %177 = vector.shape_cast %176 : vector<2x8x8xf32> to vector<16x8xf32>
    %178 = arith.truncf %177 : vector<16x8xf32> to vector<16x8xbf16>
    %c0_63 = arith.constant 0 : index
    %c0_64 = arith.constant 0 : index
    %c0_65 = arith.constant 0 : index
    %179 = vector.load %arg10[%c0_63, %c0_64, %c0_65] : memref<4x8x32xbf16, #tpu.memory_space<vmem>>, vector<1x8x32xbf16>
    %180 = vector.shape_cast %179 : vector<1x8x32xbf16> to vector<8x32xbf16>
    %cst_66 = arith.constant dense<0.000000e+00> : vector<16x32xf32>
    %181 = tpu.matmul %178, %180, %cst_66 {dimension_numbers = #tpu.dot_dimension_numbers<[1], [0], [0], [1], [0, 0, 1, 1], [], []>} : vector<16x8xbf16>, vector<8x32xbf16>, vector<16x32xf32> -> vector<16x32xf32>
    %182 = arith.addf %157, %181 : vector<16x32xf32>
    %183 = vector.extract_strided_slice %155 {offsets = [0, 0, 8], sizes = [2, 8, 8], strides = [1, 1, 1]} : vector<2x8x32xf32> to vector<2x8x8xf32>
    %184 = arith.truncf %183 : vector<2x8x8xf32> to vector<2x8x8xbf16>
    %185 = vector.extract_strided_slice %156 {offsets = [0, 0, 8], sizes = [2, 16, 8], strides = [1, 1, 1]} : vector<2x16x64xf32> to vector<2x16x8xf32>
    %186 = arith.truncf %185 : vector<2x16x8xf32> to vector<2x16x8xbf16>
    %187 = vector.extract_strided_slice %156 {offsets = [0, 0, 40], sizes = [2, 16, 8], strides = [1, 1, 1]} : vector<2x16x64xf32> to vector<2x16x8xf32>
    %188 = arith.truncf %187 : vector<2x16x8xf32> to vector<2x16x8xbf16>
    "tpu.trace_start"() <{level = 10 : i32, message = "bqd,bkd->bqk"}> : () -> ()
    %cst_67 = arith.constant dense<0.000000e+00> : vector<2x8x16xf32>
    %189 = tpu.matmul %184, %186, %cst_67 {dimension_numbers = #tpu.dot_dimension_numbers<[2], [2], [1], [1], [0, 0, 0, 1, 1, 1], [0], [0]>} : vector<2x8x8xbf16>, vector<2x16x8xbf16>, vector<2x8x16xf32> -> vector<2x8x16xf32>
    "tpu.trace_stop"() : () -> ()
    %cst_68 = arith.constant dense<0xFF800000> : vector<2x8xf32>
    %190 = vector.multi_reduction <maximumf>, %189, %cst_68 [2] : vector<2x8x16xf32> to vector<2x8xf32>
    %191 = vector.shape_cast %190 : vector<2x8xf32> to vector<2x8x1xf32>
    %192 = vector.broadcast %191 : vector<2x8x1xf32> to vector<2x8x16xf32>
    %193 = arith.subf %189, %192 : vector<2x8x16xf32>
    %194 = math.exp %193 : vector<2x8x16xf32>
    %cst_69 = arith.constant dense<0.000000e+00> : vector<2x8xf32>
    %195 = vector.multi_reduction <add>, %194, %cst_69 [2] : vector<2x8x16xf32> to vector<2x8xf32>
    %196 = vector.shape_cast %195 : vector<2x8xf32> to vector<2x8x1xf32>
    %197 = tpu.reciprocal %196 {approx = true} : vector<2x8x1xf32> -> vector<2x8x1xf32>
    %198 = vector.broadcast %197 : vector<2x8x1xf32> to vector<2x8x16xf32>
    %199 = arith.mulf %194, %198 : vector<2x8x16xf32>
    %200 = arith.truncf %199 : vector<2x8x16xf32> to vector<2x8x16xbf16>
    "tpu.trace_start"() <{level = 10 : i32, message = "bqk,bkd->bqd"}> : () -> ()
    %cst_70 = arith.constant dense<0.000000e+00> : vector<2x8x8xf32>
    %201 = tpu.matmul %200, %188, %cst_70 {dimension_numbers = #tpu.dot_dimension_numbers<[2], [1], [1], [2], [0, 0, 0, 1, 1, 2], [0], [0]>} : vector<2x8x16xbf16>, vector<2x16x8xbf16>, vector<2x8x8xf32> -> vector<2x8x8xf32>
    "tpu.trace_stop"() : () -> ()
    %202 = vector.shape_cast %201 : vector<2x8x8xf32> to vector<16x8xf32>
    %203 = arith.truncf %202 : vector<16x8xf32> to vector<16x8xbf16>
    %c1_71 = arith.constant 1 : index
    %c0_72 = arith.constant 0 : index
    %c0_73 = arith.constant 0 : index
    %204 = vector.load %arg10[%c1_71, %c0_72, %c0_73] : memref<4x8x32xbf16, #tpu.memory_space<vmem>>, vector<1x8x32xbf16>
    %205 = vector.shape_cast %204 : vector<1x8x32xbf16> to vector<8x32xbf16>
    %cst_74 = arith.constant dense<0.000000e+00> : vector<16x32xf32>
    %206 = tpu.matmul %203, %205, %cst_74 {dimension_numbers = #tpu.dot_dimension_numbers<[1], [0], [0], [1], [0, 0, 1, 1], [], []>} : vector<16x8xbf16>, vector<8x32xbf16>, vector<16x32xf32> -> vector<16x32xf32>
    %207 = arith.addf %182, %206 : vector<16x32xf32>
    %208 = vector.extract_strided_slice %155 {offsets = [0, 0, 16], sizes = [2, 8, 8], strides = [1, 1, 1]} : vector<2x8x32xf32> to vector<2x8x8xf32>
    %209 = arith.truncf %208 : vector<2x8x8xf32> to vector<2x8x8xbf16>
    %210 = vector.extract_strided_slice %156 {offsets = [0, 0, 16], sizes = [2, 16, 8], strides = [1, 1, 1]} : vector<2x16x64xf32> to vector<2x16x8xf32>
    %211 = arith.truncf %210 : vector<2x16x8xf32> to vector<2x16x8xbf16>
    %212 = vector.extract_strided_slice %156 {offsets = [0, 0, 48], sizes = [2, 16, 8], strides = [1, 1, 1]} : vector<2x16x64xf32> to vector<2x16x8xf32>
    %213 = arith.truncf %212 : vector<2x16x8xf32> to vector<2x16x8xbf16>
    "tpu.trace_start"() <{level = 10 : i32, message = "bqd,bkd->bqk"}> : () -> ()
    %cst_75 = arith.constant dense<0.000000e+00> : vector<2x8x16xf32>
    %214 = tpu.matmul %209, %211, %cst_75 {dimension_numbers = #tpu.dot_dimension_numbers<[2], [2], [1], [1], [0, 0, 0, 1, 1, 1], [0], [0]>} : vector<2x8x8xbf16>, vector<2x16x8xbf16>, vector<2x8x16xf32> -> vector<2x8x16xf32>
    "tpu.trace_stop"() : () -> ()
    %cst_76 = arith.constant dense<0xFF800000> : vector<2x8xf32>
    %215 = vector.multi_reduction <maximumf>, %214, %cst_76 [2] : vector<2x8x16xf32> to vector<2x8xf32>
    %216 = vector.shape_cast %215 : vector<2x8xf32> to vector<2x8x1xf32>
    %217 = vector.broadcast %216 : vector<2x8x1xf32> to vector<2x8x16xf32>
    %218 = arith.subf %214, %217 : vector<2x8x16xf32>
    %219 = math.exp %218 : vector<2x8x16xf32>
    %cst_77 = arith.constant dense<0.000000e+00> : vector<2x8xf32>
    %220 = vector.multi_reduction <add>, %219, %cst_77 [2] : vector<2x8x16xf32> to vector<2x8xf32>
    %221 = vector.shape_cast %220 : vector<2x8xf32> to vector<2x8x1xf32>
    %222 = tpu.reciprocal %221 {approx = true} : vector<2x8x1xf32> -> vector<2x8x1xf32>
    %223 = vector.broadcast %222 : vector<2x8x1xf32> to vector<2x8x16xf32>
    %224 = arith.mulf %219, %223 : vector<2x8x16xf32>
    %225 = arith.truncf %224 : vector<2x8x16xf32> to vector<2x8x16xbf16>
    "tpu.trace_start"() <{level = 10 : i32, message = "bqk,bkd->bqd"}> : () -> ()
    %cst_78 = arith.constant dense<0.000000e+00> : vector<2x8x8xf32>
    %226 = tpu.matmul %225, %213, %cst_78 {dimension_numbers = #tpu.dot_dimension_numbers<[2], [1], [1], [2], [0, 0, 0, 1, 1, 2], [0], [0]>} : vector<2x8x16xbf16>, vector<2x16x8xbf16>, vector<2x8x8xf32> -> vector<2x8x8xf32>
    "tpu.trace_stop"() : () -> ()
    %227 = vector.shape_cast %226 : vector<2x8x8xf32> to vector<16x8xf32>
    %228 = arith.truncf %227 : vector<16x8xf32> to vector<16x8xbf16>
    %c2_79 = arith.constant 2 : index
    %c0_80 = arith.constant 0 : index
    %c0_81 = arith.constant 0 : index
    %229 = vector.load %arg10[%c2_79, %c0_80, %c0_81] : memref<4x8x32xbf16, #tpu.memory_space<vmem>>, vector<1x8x32xbf16>
    %230 = vector.shape_cast %229 : vector<1x8x32xbf16> to vector<8x32xbf16>
    %cst_82 = arith.constant dense<0.000000e+00> : vector<16x32xf32>
    %231 = tpu.matmul %228, %230, %cst_82 {dimension_numbers = #tpu.dot_dimension_numbers<[1], [0], [0], [1], [0, 0, 1, 1], [], []>} : vector<16x8xbf16>, vector<8x32xbf16>, vector<16x32xf32> -> vector<16x32xf32>
    %232 = arith.addf %207, %231 : vector<16x32xf32>
    %233 = vector.extract_strided_slice %155 {offsets = [0, 0, 24], sizes = [2, 8, 8], strides = [1, 1, 1]} : vector<2x8x32xf32> to vector<2x8x8xf32>
    %234 = arith.truncf %233 : vector<2x8x8xf32> to vector<2x8x8xbf16>
    %235 = vector.extract_strided_slice %156 {offsets = [0, 0, 24], sizes = [2, 16, 8], strides = [1, 1, 1]} : vector<2x16x64xf32> to vector<2x16x8xf32>
    %236 = arith.truncf %235 : vector<2x16x8xf32> to vector<2x16x8xbf16>
    %237 = vector.extract_strided_slice %156 {offsets = [0, 0, 56], sizes = [2, 16, 8], strides = [1, 1, 1]} : vector<2x16x64xf32> to vector<2x16x8xf32>
    %238 = arith.truncf %237 : vector<2x16x8xf32> to vector<2x16x8xbf16>
    "tpu.trace_start"() <{level = 10 : i32, message = "bqd,bkd->bqk"}> : () -> ()
    %cst_83 = arith.constant dense<0.000000e+00> : vector<2x8x16xf32>
    %239 = tpu.matmul %234, %236, %cst_83 {dimension_numbers = #tpu.dot_dimension_numbers<[2], [2], [1], [1], [0, 0, 0, 1, 1, 1], [0], [0]>} : vector<2x8x8xbf16>, vector<2x16x8xbf16>, vector<2x8x16xf32> -> vector<2x8x16xf32>
    "tpu.trace_stop"() : () -> ()
    %cst_84 = arith.constant dense<0xFF800000> : vector<2x8xf32>
    %240 = vector.multi_reduction <maximumf>, %239, %cst_84 [2] : vector<2x8x16xf32> to vector<2x8xf32>
    %241 = vector.shape_cast %240 : vector<2x8xf32> to vector<2x8x1xf32>
    %242 = vector.broadcast %241 : vector<2x8x1xf32> to vector<2x8x16xf32>
    %243 = arith.subf %239, %242 : vector<2x8x16xf32>
    %244 = math.exp %243 : vector<2x8x16xf32>
    %cst_85 = arith.constant dense<0.000000e+00> : vector<2x8xf32>
    %245 = vector.multi_reduction <add>, %244, %cst_85 [2] : vector<2x8x16xf32> to vector<2x8xf32>
    %246 = vector.shape_cast %245 : vector<2x8xf32> to vector<2x8x1xf32>
    %247 = tpu.reciprocal %246 {approx = true} : vector<2x8x1xf32> -> vector<2x8x1xf32>
    %248 = vector.broadcast %247 : vector<2x8x1xf32> to vector<2x8x16xf32>
    %249 = arith.mulf %244, %248 : vector<2x8x16xf32>
    %250 = arith.truncf %249 : vector<2x8x16xf32> to vector<2x8x16xbf16>
    "tpu.trace_start"() <{level = 10 : i32, message = "bqk,bkd->bqd"}> : () -> ()
    %cst_86 = arith.constant dense<0.000000e+00> : vector<2x8x8xf32>
    %251 = tpu.matmul %250, %238, %cst_86 {dimension_numbers = #tpu.dot_dimension_numbers<[2], [1], [1], [2], [0, 0, 0, 1, 1, 2], [0], [0]>} : vector<2x8x16xbf16>, vector<2x16x8xbf16>, vector<2x8x8xf32> -> vector<2x8x8xf32>
    "tpu.trace_stop"() : () -> ()
    %252 = vector.shape_cast %251 : vector<2x8x8xf32> to vector<16x8xf32>
    %253 = arith.truncf %252 : vector<16x8xf32> to vector<16x8xbf16>
    %c3_87 = arith.constant 3 : index
    %c0_88 = arith.constant 0 : index
    %c0_89 = arith.constant 0 : index
    %254 = vector.load %arg10[%c3_87, %c0_88, %c0_89] : memref<4x8x32xbf16, #tpu.memory_space<vmem>>, vector<1x8x32xbf16>
    %255 = vector.shape_cast %254 : vector<1x8x32xbf16> to vector<8x32xbf16>
    %cst_90 = arith.constant dense<0.000000e+00> : vector<16x32xf32>
    %256 = tpu.matmul %253, %255, %cst_90 {dimension_numbers = #tpu.dot_dimension_numbers<[1], [0], [0], [1], [0, 0, 1, 1], [], []>} : vector<16x8xbf16>, vector<8x32xbf16>, vector<16x32xf32> -> vector<16x32xf32>
    %257 = arith.addf %232, %256 : vector<16x32xf32>
    %258 = arith.addf %124, %257 : vector<16x32xf32>
    %259 = arith.mulf %258, %258 : vector<16x32xf32>
    %cst_91 = arith.constant dense<0.000000e+00> : vector<16xf32>
    %260 = vector.multi_reduction <add>, %259, %cst_91 [1] : vector<16x32xf32> to vector<16xf32>
    %261 = vector.shape_cast %260 : vector<16xf32> to vector<16x1xf32>
    %cst_92 = arith.constant 3.200000e+01 : f32
    %262 = vector.broadcast %cst_92 : f32 to vector<16x1xf32>
    %263 = arith.divf %261, %262 : vector<16x1xf32>
    %cst_93 = arith.constant 9.99999997E-7 : f32
    %264 = vector.broadcast %cst_93 : f32 to vector<16x1xf32>
    %265 = arith.addf %263, %264 : vector<16x1xf32>
    %266 = math.rsqrt %265 : vector<16x1xf32>
    %267 = vector.broadcast %266 : vector<16x1xf32> to vector<16x32xf32>
    %268 = arith.mulf %258, %267 : vector<16x32xf32>
    %269 = vector.broadcast %6 : vector<1x32xf32> to vector<16x32xf32>
    %270 = arith.mulf %268, %269 : vector<16x32xf32>
    %271 = arith.truncf %270 : vector<16x32xf32> to vector<16x32xbf16>
    %c0_94 = arith.constant 0 : index
    %c0_95 = arith.constant 0 : index
    %272 = vector.load %arg11[%c0_94, %c0_95] : memref<32x256xbf16, #tpu.memory_space<vmem>>, vector<32x256xbf16>
    %cst_96 = arith.constant dense<0.000000e+00> : vector<16x256xf32>
    %273 = tpu.matmul %271, %272, %cst_96 {dimension_numbers = #tpu.dot_dimension_numbers<[1], [0], [0], [1], [0, 0, 1, 1], [], []>} : vector<16x32xbf16>, vector<32x256xbf16>, vector<16x256xf32> -> vector<16x256xf32>
    %274 = vector.extract_strided_slice %273 {offsets = [0, 0], sizes = [16, 128], strides = [1, 1]} : vector<16x256xf32> to vector<16x128xf32>
    %275 = vector.extract_strided_slice %273 {offsets = [0, 128], sizes = [16, 128], strides = [1, 1]} : vector<16x256xf32> to vector<16x128xf32>
    %cst_97 = arith.constant 0.000000e+00 : f32
    %276 = vector.broadcast %cst_97 : f32 to vector<16x128xf32>
    %277 = arith.subf %276, %274 : vector<16x128xf32>
    %278 = math.exp %277 : vector<16x128xf32>
    %cst_98 = arith.constant 1.000000e+00 : f32
    %279 = vector.broadcast %cst_98 : f32 to vector<16x128xf32>
    %280 = arith.addf %279, %278 : vector<16x128xf32>
    %281 = tpu.reciprocal %280 {approx = true} : vector<16x128xf32> -> vector<16x128xf32>
    %282 = arith.mulf %274, %281 : vector<16x128xf32>
    %283 = arith.mulf %282, %275 : vector<16x128xf32>
    %284 = arith.truncf %283 : vector<16x128xf32> to vector<16x128xbf16>
    %c0_99 = arith.constant 0 : index
    %c0_100 = arith.constant 0 : index
    %285 = vector.load %arg12[%c0_99, %c0_100] : memref<128x32xbf16, #tpu.memory_space<vmem>>, vector<128x32xbf16>
    %cst_101 = arith.constant dense<0.000000e+00> : vector<16x32xf32>
    %286 = tpu.matmul %284, %285, %cst_101 {dimension_numbers = #tpu.dot_dimension_numbers<[1], [0], [0], [1], [0, 0, 1, 1], [], []>} : vector<16x128xbf16>, vector<128x32xbf16>, vector<16x32xf32> -> vector<16x32xf32>
    %287 = arith.addf %258, %286 : vector<16x32xf32>
    %288 = vector.shape_cast %287 : vector<16x32xf32> to vector<2x8x32xf32>
    %c0_102 = arith.constant 0 : index
    %c0_103 = arith.constant 0 : index
    %c0_104 = arith.constant 0 : index
    %289 = vector.load %arg13[%c0_102, %c0_103, %c0_104] : memref<2x8x32xf32, #tpu.memory_space<vmem>>, vector<2x8x32xf32>
    tpu.vector_store %arg13[%c0_102, %c0_103, %c0_104], %288 {strides = array<i32>} : memref<2x8x32xf32, #tpu.memory_space<vmem>>, vector<2x8x32xf32>,
    return
  }
  func.func @transform_0(%arg0: i32) -> (i32, i32, i32) {
    %c0_i32 = arith.constant 0 : i32
    %c0_i32_0 = arith.constant 0 : i32
    %c0_i32_1 = arith.constant 0 : i32
    return %arg0, %c0_i32, %c0_i32_0 : i32, i32, i32
  }
  func.func @transform_1(%arg0: i32) -> (i32, i32, i32) {
    %c0_i32 = arith.constant 0 : i32
    %c0_i32_0 = arith.constant 0 : i32
    %c0_i32_1 = arith.constant 0 : i32
    return %arg0, %c0_i32, %c0_i32_0 : i32, i32, i32
  }
  func.func @transform_2(%arg0: i32) -> (i32, i32) {
    %c0_i32 = arith.constant 0 : i32
    %c0_i32_0 = arith.constant 0 : i32
    %c0_i32_1 = arith.constant 0 : i32
    return %c0_i32, %c0_i32_0 : i32, i32
  }
  func.func @transform_3(%arg0: i32) -> (i32, i32) {
    %c0_i32 = arith.constant 0 : i32
    %c0_i32_0 = arith.constant 0 : i32
    %c0_i32_1 = arith.constant 0 : i32
    return %c0_i32, %c0_i32_0 : i32, i32
  }
  func.func @transform_4(%arg0: i32) -> (i32, i32) {
    %c0_i32 = arith.constant 0 : i32
    %c0_i32_0 = arith.constant 0 : i32
    %c0_i32_1 = arith.constant 0 : i32
    return %c0_i32, %c0_i32_0 : i32, i32
  }
  func.func @transform_5(%arg0: i32) -> (i32, i32) {
    %c0_i32 = arith.constant 0 : i32
    %c0_i32_0 = arith.constant 0 : i32
    %c0_i32_1 = arith.constant 0 : i32
    return %c0_i32, %c0_i32_0 : i32, i32
  }
  func.func @transform_6(%arg0: i32) -> (i32, i32, i32) {
    %c0_i32 = arith.constant 0 : i32
    %c0_i32_0 = arith.constant 0 : i32
    %c0_i32_1 = arith.constant 0 : i32
    %c0_i32_2 = arith.constant 0 : i32
    return %c0_i32, %c0_i32_0, %c0_i32_1 : i32, i32, i32
  }
  func.func @transform_7(%arg0: i32) -> (i32, i32) {
    %c0_i32 = arith.constant 0 : i32
    %c0_i32_0 = arith.constant 0 : i32
    %c0_i32_1 = arith.constant 0 : i32
    return %c0_i32, %c0_i32_0 : i32, i32
  }
  func.func @transform_8(%arg0: i32) -> (i32, i32) {
    %c0_i32 = arith.constant 0 : i32
    %c0_i32_0 = arith.constant 0 : i32
    %c0_i32_1 = arith.constant 0 : i32
    return %c0_i32, %c0_i32_0 : i32, i32
  }
  func.func @transform_9(%arg0: i32) -> (i32, i32, i32) {
    %c0_i32 = arith.constant 0 : i32
    %c0_i32_0 = arith.constant 0 : i32
    %c0_i32_1 = arith.constant 0 : i32
    %c0_i32_2 = arith.constant 0 : i32
    return %c0_i32, %c0_i32_0, %c0_i32_1 : i32, i32, i32
  }
  func.func @transform_10(%arg0: i32) -> (i32, i32) {
    %c0_i32 = arith.constant 0 : i32
    %c0_i32_0 = arith.constant 0 : i32
    %c0_i32_1 = arith.constant 0 : i32
    return %c0_i32, %c0_i32_0 : i32, i32
  }
  func.func @transform_11(%arg0: i32) -> (i32, i32) {
    %c0_i32 = arith.constant 0 : i32
    %c0_i32_0 = arith.constant 0 : i32
    %c0_i32_1 = arith.constant 0 : i32
    return %c0_i32, %c0_i32_0 : i32, i32
  }
  func.func @transform_12(%arg0: i32) -> (i32, i32, i32) {
    %c0_i32 = arith.constant 0 : i32
    %c0_i32_0 = arith.constant 0 : i32
    %c0_i32_1 = arith.constant 0 : i32
    return %arg0, %c0_i32, %c0_i32_0 : i32, i32, i32
  }
}

</mosaic_0001>

<bundles_post_ra>
// kernel: tpu_custom_call.1
= control target key start
LH: loop header
LB: loop body
LE: loop exit
PB: predicated region body
PF: predicated region fallthrough
CT: control target
= control target key end

     0   :  { %17 = vsyncpa [#allocation3], 0  ;;  %s4210_s0 = inlined_call_operand.vmem [shape: f32[2,8,32], index: 0, kind: input, shape index: {}]   ;;  %s4211_s1 = inlined_call_operand.vmem [shape: f32[2,16,32], index: 1, kind: input, shape index: {}]   ;;  %s4212_s2 = inlined_call_operand.vmem [shape: f32[1,32], index: 2, kind: input, shape index: {}]   ;;  %s4213_s3 = inlined_call_operand.vmem [shape: f32[1,32], index: 3, kind: input, shape index: {}]   ;;  %s4214_s4 = inlined_call_operand.hbm [shape: f32[1,32], index: 4, kind: input, shape index: {}]   ;;  %s4215_s5 = inlined_call_operand.hbm [shape: bf16[32,96], index: 5, kind: input, shape index: {}]   ;;  %s4216_s6 = inlined_call_operand.hbm [shape: bf16[4,8,32], index: 6, kind: input, shape index: {}]   ;;  %s4217_s7 = inlined_call_operand.hbm [shape: bf16[32,32], index: 7, kind: input, shape index: {}]   ;;  %s4218_s8 = inlined_call_operand.hbm [shape: bf16[32,64], index: 8, kind: input, shape index: {}]   ;;  %s4219_s9 = inlined_call_operand.vmem [shape: bf16[4,8,32], index: 9, kind: input, shape index: {}]   ;;  %s4220_s10 = inlined_call_operand.vmem [shape: bf16[32,256], index: 10, kind: input, shape index: {}]   ;;  %s4221_s11 = inlined_call_operand.vmem [shape: bf16[128,32], index: 11, kind: input, shape index: {}]   ;;  %s4222_s12 = inlined_call_operand.hbm [shape: f32[2,8,32], index: 12, kind: output, shape index: {}]  }
   0x1   :  { %18 = vsyncpa [#allocation6], 0 }
   0x2   :  { %19 = vsyncpa [#allocation9], 0 }
   0x3   :  { %20 = vsyncpa [#allocation4], 0  ;;  %s3521_s21 = smov [#allocation5]   ;;  %s3381_s25 = scalar_lea.hbm %s4215_s5, 256 }
   0x4   :  { %s44_s22 = sshll.u32 %s3521_s21, 4  ;;  %p3382_p0 = scmp.ne.s32.totalorder %s4215_s5, %s3381_s25  ;;  %s45_s22 = int_to_ptr.vmem [resolvable:$true] %s44_s22 }
   0x5   :  { %p3385_p1 = scmp.lt.u32.totalorder %s3381_s25, %s4215_s5 }
   0x7   :  { %p3387_p2 = pnand %p3385_p1, %p3382_p0 }
   0x9   :  { %3390 = shalt.err (!%p3387_p2)
}
   0xa   :  { %s3391_s30 = scalar_lea.vmem %s45_s22, 256  ;;  %p3396_p4 = scmp.lt.s32.totalorder %s45_s22, %s45_s22 }
   0xb   :  { %p3392_p3 = scmp.ne.s32.totalorder %s45_s22, %s3391_s30  ;;  %p3397_p5 = scmp.lt.s32.totalorder %s3391_s30, %s3391_s30 }
   0xd   :  { %p3398_p6 = por %p3397_p5, %p3396_p4 }
   0xf   :  { %p3399_p7 = pnand %p3398_p6, %p3392_p3 }
  0x11   :  { %3402 = shalt.err (!%p3399_p7)
}
  0x12   :  { %s3522_s13 = smov 64   ;;  %s3523_s14 = smov 4  }
  0x13   :  { %50 = dma.hbm_to_vmem [thread:$0]  %s4215_s5, 256, %s45_s22, [#allocation6], %s3522_s13, %s3522_s13, %s3523_s14  }
  0x14   :  { %s3524_s17 = smov [#allocation8]   ;;  %s3525_s19 = smov [#allocation2]  }
  0x15   :  { %s68_s18 = sshll.u32 %s3524_s17, 4  ;;  %s35_s20 = sshll.u32 %s3525_s19, 4  ;;  %s69_s18 = int_to_ptr.vmem [resolvable:$true] %s68_s18  ;;  %s36_s20 = int_to_ptr.vmem [resolvable:$true] %s35_s20 }
  0x16   :  { %s3403_s24 = scalar_lea.hbm %s4217_s7, 256 }
  0x17   :  { %p3404_p8 = scmp.ne.s32.totalorder %s4217_s7, %s3403_s24  ;;  %p3407_p9 = scmp.lt.u32.totalorder %s3403_s24, %s4217_s7 }
  0x19   :  { %p3409_p10 = pnand %p3407_p9, %p3404_p8 }
  0x1b   :  { %3412 = shalt.err (!%p3409_p10)
}
  0x1c   :  { %s3413_s5 = scalar_lea.vmem %s69_s18, 256  ;;  %p3418_p12 = scmp.lt.s32.totalorder %s69_s18, %s69_s18 }
  0x1d   :  { %p3414_p11 = scmp.ne.s32.totalorder %s69_s18, %s3413_s5  ;;  %p3419_p13 = scmp.lt.s32.totalorder %s3413_s5, %s3413_s5 }
  0x1f   :  { %p3420_p0 = por %p3419_p13, %p3418_p12 }
  0x21   :  { %p3421_p1 = pnand %p3420_p0, %p3414_p11 }
  0x23   :  { %3424 = shalt.err (!%p3421_p1)
}
  0x24   :  { %74 = dma.hbm_to_vmem [thread:$0]  %s4217_s7, 256, %s69_s18, [#allocation9], %s3522_s13, %s3522_s13, %s3523_s14  }
  0x25   :  { %s3425_s16 = scalar_lea.hbm %s4214_s4, 16 }
  0x26   :  { %p3426_p2 = scmp.ne.s32.totalorder %s4214_s4, %s3425_s16  ;;  %p3429_p3 = scmp.lt.u32.totalorder %s3425_s16, %s4214_s4 }
  0x28   :  { %p3431_p4 = pnand %p3429_p3, %p3426_p2 }
  0x2a   :  { %3434 = shalt.err (!%p3431_p4)
}
  0x2b   :  { %s3435_s24 = scalar_lea.vmem %s36_s20, 16  ;;  %s3439_s25 = scalar_lea.vmem %s36_s20, 32 }
  0x2c   :  { %p3436_p5 = scmp.ne.s32.totalorder %s36_s20, %s3435_s24  ;;  %p3440_p6 = scmp.lt.s32.totalorder %s36_s20, %s36_s20 }
  0x2d   :  { %p3441_p7 = scmp.lt.s32.totalorder %s3439_s25, %s3435_s24 }
  0x2f   :  { %p3442_p8 = por %p3441_p7, %p3440_p6 }
  0x31   :  { %p3443_p9 = pnand %p3442_p8, %p3436_p5 }
  0x33   :  { %3446 = shalt.err (!%p3443_p9)
}
  0x34   :  { %38 = dma.hbm_to_vmem [thread:$0]  %s4214_s4, 16, %s36_s20, [#allocation3]  }
  0x35   :  { %s3526_s26 = smov [#allocation7]   ;;  %s3527_s28 = smov [#allocation10]  }
  0x36   :  { %s56_s27 = sshll.u32 %s3526_s26, 4  ;;  %s80_s5 = sshll.u32 %s3527_s28, 4  ;;  %s57_s27 = int_to_ptr.vmem [resolvable:$true] %s56_s27  ;;  %s81_s5 = int_to_ptr.vmem [resolvable:$true] %s80_s5 }
  0x37   :  { %s3447_s30 = scalar_lea.hbm %s4216_s6, 256 }
  0x38   :  { %p3448_p10 = scmp.ne.s32.totalorder %s4216_s6, %s3447_s30  ;;  %p3451_p11 = scmp.lt.u32.totalorder %s3447_s30, %s4216_s6 }
  0x3a   :  { %p3453_p12 = pnand %p3451_p11, %p3448_p10 }
  0x3c   :  { %3456 = shalt.err (!%p3453_p12)
}
  0x3d   :  { %s3457_s4 = scalar_lea.vmem %s57_s27, 256  ;;  %p3462_p0 = scmp.lt.s32.totalorder %s57_s27, %s57_s27 }
  0x3e   :  { %p3458_p13 = scmp.ne.s32.totalorder %s57_s27, %s3457_s4  ;;  %p3463_p1 = scmp.lt.s32.totalorder %s3457_s4, %s3457_s4 }
  0x40   :  { %p3464_p2 = por %p3463_p1, %p3462_p0 }
  0x42   :  { %p3465_p3 = pnand %p3464_p2, %p3458_p13 }
  0x44   :  { %3468 = shalt.err (!%p3465_p3)
}
  0x45   :  { %62 = dma.hbm_to_vmem [thread:$0]  %s4216_s6, 256, %s57_s27, [#allocation6], %s3522_s13, %s3522_s13, %s3523_s14  }
  0x46   :  { %s3469_s25 = scalar_lea.hbm %s4218_s8, 256 }
  0x47   :  { %p3470_p4 = scmp.ne.s32.totalorder %s4218_s8, %s3469_s25  ;;  %p3473_p5 = scmp.lt.u32.totalorder %s3469_s25, %s4218_s8 }
  0x49   :  { %p3475_p6 = pnand %p3473_p5, %p3470_p4 }
  0x4b   :  { %3478 = shalt.err (!%p3475_p6)
}
  0x4c   :  { %s3479_s22 = scalar_lea.vmem %s81_s5, 256  ;;  %p3484_p8 = scmp.lt.s32.totalorder %s81_s5, %s81_s5 }
  0x4d   :  { %p3480_p7 = scmp.ne.s32.totalorder %s81_s5, %s3479_s22  ;;  %p3485_p9 = scmp.lt.s32.totalorder %s3479_s22, %s3479_s22 }
  0x4f   :  { %p3486_p10 = por %p3485_p9, %p3484_p8 }
  0x51   :  { %p3487_p11 = pnand %p3486_p10, %p3480_p7 }
  0x53   :  { %3490 = shalt.err (!%p3487_p11)
}
  0x54   :  { %86 = dma.hbm_to_vmem [thread:$0]  %s4218_s8, 256, %s81_s5, [#allocation9], %s3522_s13, %s3522_s13, %s3523_s14  }
  0x55   :  { %3513 = dma.done.wait [#allocation3], 16  }
  0x56   :  { %3514 = vsyncadd [#allocation3], 4294967280 }
  0x57   :  { %3515 = dma.done.wait [#allocation6], 512  }
  0x58   :  { %3516 = vsyncadd [#allocation6], 4294966784 }
  0x59   :  { %3517 = dma.done.wait [#allocation9], 512  }
  0x5a   :  { %3518 = vsyncadd [#allocation9], 4294966784  ;;  %v3684_v0 = vld [vmem:[%s4210_s0] sm:$0xff]  ;;  %vm120_vm0 = vcmask 261120   ;;  %v3689_v1 = vld [vmem:[%s4210_s0 + $0x8] sm:$0xff]  ;;  %v3528_v7 = vmov 0.0  }
  0x5b   :  { %v118_v2 = vmul.f32 %v3684_v0, %v3684_v0  ;;  %v119_v3 = vmul.f32 %v3689_v1, %v3689_v1  ;;  %v3269_v6 = vld [vmem:[#allocation5] sm:$0xff]   ;;  %2962 = vmatprep.subr.bf16.mxu1 %v3528_v7  ;;  %vm3529_vm1 = vmmov 0   ;;  %v3270_v8 = vld [vmem:[#allocation5 + $0x8] sm:$0xff]   ;;  %2988 = vmatprep.subr.bf16.mxu0 %v3528_v7  ;;  %v3709_v18 = vld [vmem:[%s4212_s2] ss:$0 sm:$0xff]  ;;  %s3530_s14 = smov 96  }
  0x5c   :  { %2966 = vmatprep.mubr.msk.bf16.mxu1 %vm3529_vm1, %v3528_v7  ;;  %2963 = vmatpush3.bf16.msra.mxu1 %v3269_v6  ;;  %vm210_vm2 = vcmask 64512   ;;  %s3531_s2 = smov 88   ;;  %vm335_vm3 = vcmask 1043456   ;;  %s3533_s5 = smov 56   ;;  %vm1582_vm4 = vcmask 130048  }
  0x5d   :  { %v121_v4 = vsel %vm120_vm0, %v118_v2, 0.0  ;;  %v124_v5 = vsel %vm120_vm0, %v119_v3, 0.0  ;;  %2964 = vmatprep.subr.bf16.mxu1 %v3528_v7  ;;  %2990 = vmatprep.mubr.msk.bf16.mxu0 %vm3529_vm1, %v3528_v7  ;;  %s3534_s17 = smov 80   ;;  %s3535_s19 = smov 112  }
  0x5e   :  { %122 = vadd.xlane.f32.xlu0 %v121_v4  ;;  %s3536_s4 = smov 48   ;;  %s3537_s20 = smov 72  }
  0x5f   :  { %s3538_s21 = smov 104   ;;  %s3539_s23 = smov 40  }
  0x60   :  { %2965 = vmatpush3.bf16.msra.mxu1 %v3270_v8 }
  0x61   :  { %2970 = vmatprep.subr.bf16.mxu1 %v3528_v7 }
  0x62   :  { %125 = vadd.xlane.f32.xlu0 %v124_v5 }
  0xeb   :  { %v123_v9 = vpop.xlane.xlu0 %122 }
  0xec   :  { %v128_v10 = vmul.f32 0.03125, %v123_v9 }
  0xee   :  { %v130_v11 = vadd.f32 1e-06, %v128_v10 }
  0xef   :  { %v126_v12 = vpop.xlane.xlu0 %125 }
  0xf0   :  { %3289 = vrsqrt.f32 %v130_v11  ;;  %v129_v13 = vmul.f32 0.03125, %v126_v12 }
  0xf2   :  { %v131_v14 = vadd.f32 1e-06, %v129_v13 }
  0xf4   :  { %3291 = vrsqrt.f32 %v131_v14 }
  0xfa   :  { %v3290_v15 = vpop.eup %3289 }
  0xfb   :  { %v134_v16 = vmul.f32 %v3290_v15, %v3684_v0 }
  0xfd   :  { %v142_v20 = vmul.f32 %v3709_v18, %v134_v16 }
  0xfe   :  { %v3292_v17 = vpop.eup %3291 }
  0xff   :  { %v135_v19 = vmul.f32 %v3292_v17, %v3689_v1 }
 0x101   :  { %v143_v21 = vmul.f32 %v3709_v18, %v135_v19 }
 0x103   :  { %v144_v22 = vpack.c.bf16 %v143_v21, %v142_v20 }
 0x105   :  { %2967 = vmatmul.mubr.msk.bf16.vlgmr.msra.gmra.mrb[0].mxu1 %vm120_vm0, %v144_v22 }
 0x106   :  { %2972 = vmatprep.mubr.msk.bf16.mxu1 %vm3529_vm1, %v3528_v7 }
 0x1d8   :  { %v198_v23 = vpop.f32.mrb[0].mxu1 }
 0x1d9   :  { %v3717_v24 = vpack.c.bf16 %v198_v23, %v198_v23  ;;  %v2968_v25 = vpop.f32.mrb[1].mxu1 }
 0x1da   :  { %v201_v26 = vpop.f32.mrb[2].mxu1 }
 0x1db   :  { %208 = vrot.lane.b32.xlu1 %v3717_v24, %s3530_s14  ;;  %v2969_v27 = vpop.f32.mrb[3].mxu1  ;;  %v3721_v28 = vpack.c.bf16 %v201_v26, %v201_v26 }
 0x1df   :  { %258 = vrot.lane.b32.xlu1 %v3721_v28, %s3530_s14 }
 0x24d   :  { %v209_v29 = vpop.permute.xlu1 %208 }
 0x24e   :  { %v215_v30 = vsel %vm210_vm2, %v209_v29, 0 }
 0x24f   :  { %2971 = vmatpush3.bf16.xpose.msra.mxu1 %v215_v30 }
 0x250   :  { %2976 = vmatprep.subr.bf16.mxu1 %v3528_v7 }
 0x251   :  { %v259_v31 = vpop.permute.xlu1 %258 }
 0x252   :  { %v264_v32 = vsel %vm210_vm2, %v259_v31, 0 }
 0x256   :  { %2973 = vmatmul.mubr.msk.bf16.vlgmr.msra.gmra.mrb[4].mxu1 %vm210_vm2, %v3717_v24 }
 0x257   :  { %2977 = vmatpush3.bf16.xpose.msra.mxu1 %v264_v32  ;;  %2978 = vmatprep.mubr.msk.bf16.mxu1 %vm3529_vm1, %v3528_v7 }
 0x258   :  { %2982 = vmatprep.subr.bf16.mxu1 %v3528_v7 }
 0x25e   :  { %2979 = vmatmul.mubr.msk.bf16.vlgmr.msra.gmra.mrb[8].mxu1 %vm210_vm2, %v3721_v28 }
 0x25f   :  { %2984 = vmatprep.mubr.msk.bf16.mxu1 %vm3529_vm1, %v3528_v7 }
 0x329   :  { %v251_v33 = vpop.f32.mrb[4].mxu1 }
 0x32a   :  { %v2974_v34 = vpop.f32.mrb[5].mxu1  ;;  %v306_v35 = vsel %vm210_vm2, %v251_v33, -inf }
 0x32b   :  { %307 = vmax.xlane.f32.xlu0 %v306_v35  ;;  %v254_v36 = vpop.f32.mrb[6].mxu1 }
 0x32c   :  { %v2975_v37 = vpop.f32.mrb[7].mxu1 }
 0x331   :  { %v300_v38 = vpop.f32.mrb[8].mxu1 }
 0x332   :  { %v2980_v39 = vpop.f32.mrb[9].mxu1  ;;  %v309_v40 = vsel %vm210_vm2, %v300_v38, -inf }
 0x333   :  { %310 = vmax.xlane.f32.xlu1 %v309_v40  ;;  %v303_v41 = vpop.f32.mrb[10].mxu1 }
 0x334   :  { %v2981_v42 = vpop.f32.mrb[11].mxu1 }
 0x341   :  { %330 = vrot.lane.b32.xlu0 %v3717_v24, %s3522_s13 }
 0x344   :  { %431 = vrot.lane.b32.xlu1 %v3717_v24, %s3531_s2 }
 0x345   :  { %379 = vrot.lane.b32.xlu0 %v3721_v28, %s3522_s13  ;;  %s3532_s13 = smov 120  }
 0x3b8   :  { %v308_v43 = vpop.xlane.xlu0 %307 }
 0x3b9   :  { %v312_v44 = vsub.f32 %v251_v33, %v308_v43 }
 0x3bb   :  { %v314_v45 = vmul.f32 1.442695, %v312_v44 }
 0x3bc   :  { %v331_v46 = vpop.permute.xlu0 %330 }
 0x3bd   :  { %3293 = vpow2.f32 %v314_v45  ;;  %v337_v47 = vsel %vm335_vm3, %v331_v46, 0 }
 0x3be   :  { %2983 = vmatpush3.bf16.msra.mxu1 %v337_v47 }
 0x3bf   :  { %2994 = vmatprep.subr.bf16.mxu1 %v3528_v7 }
 0x3c0   :  { %v380_v48 = vpop.permute.xlu0 %379  ;;  %v311_v49 = vpop.xlane.xlu1 %310 }
 0x3c1   :  { %v313_v50 = vsub.f32 %v300_v38, %v311_v49  ;;  %v385_v51 = vsel %vm335_vm3, %v380_v48, 0 }
 0x3c2   :  { %2989 = vmatpush3.bf16.msra.mxu0 %v385_v51 }
 0x3c3   :  { %v316_v52 = vmul.f32 1.442695, %v313_v50  ;;  %3000 = vmatprep.subr.bf16.mxu0 %v3528_v7 }
 0x3c4   :  { %v432_v61 = vpop.permute.xlu1 %431 }
 0x3c5   :  { %3295 = vpow2.f32 %v316_v52  ;;  %v437_v63 = vsel %vm210_vm2, %v432_v61, 0  ;;  %v428_v52 = vld [vmem:[#allocation7] sm:$0xf] }
 0x3c7   :  { %v3294_v53 = vpop.eup %3293 }
 0x3c8   :  { %v318_v54 = vsel %vm210_vm2, %v3294_v53, 0.0 }
 0x3c9   :  { %319 = vadd.xlane.f32.xlu0 %v318_v54 }
 0x3cf   :  { %v3296_v55 = vpop.eup %3295 }
 0x3d0   :  { %v321_v56 = vsel %vm210_vm2, %v3296_v55, 0.0 }
 0x3d1   :  { %322 = vadd.xlane.f32.xlu0 %v321_v56 }
 0x3e7   :  { %481 = vrot.lane.b32.xlu0 %v3721_v28, %s3531_s2 }
 0x3eb   :  { %429 = vrot.lane.b32.xlu0 %v3717_v24, %s3532_s13 }
 0x3ef   :  { %479 = vrot.lane.b32.xlu0 %v3721_v28, %s3532_s13 }
 0x456   :  { %v320_v57 = vpop.xlane.xlu0 %319 }
 0x457   :  { %3297 = vrcp.f32 %v320_v57 }
 0x45e   :  { %v323_v58 = vpop.xlane.xlu0 %322 }
 0x45f   :  { %3299 = vrcp.f32 %v323_v58 }
 0x461   :  { %v3298_v59 = vpop.eup %3297 }
 0x462   :  { %v326_v60 = vmul.f32 %v3298_v59, %v3294_v53  ;;  %v482_v2 = vpop.permute.xlu0 %481 }
 0x463   :  { %v487_v8 = vsel %vm210_vm2, %v482_v2, 0 }
 0x464   :  { %v328_v62 = vpack.c.bf16 %v326_v60, %v326_v60  ;;  %v651_v60 = vld [vmem:[#allocation7 + $0x4] sm:$0xf] }
 0x465   :  { %v656_v61 = vsel %vm335_vm3, %v651_v60, 0 }
 0x466   :  { %2985 = vmatmul.mubr.msk.bf16.vlgmr.msra.gmra.mrb[12].mxu1 %vm210_vm2, %v328_v62  ;;  %v430_v6 = vpop.permute.xlu0 %429 }
 0x467   :  { %2995 = vmatpush3.bf16.xpose.msra.mxu1 %v437_v63  ;;  %2996 = vmatprep.mubr.msk.bf16.mxu1 %vm3529_vm1, %v3528_v7 }
 0x468   :  { %3006 = vmatprep.subr.bf16.mxu1 %v3528_v7 }
 0x469   :  { %v3300_v3 = vpop.eup %3299 }
 0x46a   :  { %v327_v4 = vmul.f32 %v3300_v3, %v3296_v55  ;;  %v480_v9 = vpop.permute.xlu0 %479  ;;  %v703_v55 = vsel %vm335_vm3, %v428_v52, 0 }
 0x46c   :  { %v329_v5 = vpack.c.bf16 %v327_v4, %v327_v4 }
 0x46e   :  { %2991 = vmatmul.mubr.msk.bf16.vlgmr.msra.gmra.mrb[0].mxu0 %vm210_vm2, %v329_v5  ;;  %2997 = vmatmul.mubr.msk.bf16.vlgmr.msra.gmra.mrb[16].mxu1 %vm210_vm2, %v430_v6 }
 0x46f   :  { %3001 = vmatpush3.bf16.xpose.msra.mxu0 %v487_v8  ;;  %3002 = vmatprep.mubr.msk.bf16.mxu0 %vm3529_vm1, %v3528_v7 }
 0x470   :  { %3012 = vmatprep.subr.bf16.mxu0 %v3528_v7  ;;  %3008 = vmatprep.mubr.msk.bf16.mxu1 %vm3529_vm1, %v3528_v7 }
 0x476   :  { %3003 = vmatmul.mubr.msk.bf16.vlgmr.msra.gmra.mrb[4].mxu0 %vm210_vm2, %v480_v9 }
 0x477   :  { %3014 = vmatprep.mubr.msk.bf16.mxu0 %vm3529_vm1, %v3528_v7 }
 0x539   :  { %v3773_v10 = vpop.f32.mrb[12].mxu1 }
 0x53a   :  { %v2986_v11 = vpop.f32.mrb[13].mxu1 }
 0x53b   :  { %v376_v12 = vpop.f32.mrb[14].mxu1 }
 0x53c   :  { %v2987_v13 = vpop.f32.mrb[15].mxu1 }
 0x541   :  { %v3775_v14 = vpop.f32.mrb[0].mxu0  ;;  %v473_v15 = vpop.f32.mrb[16].mxu1 }
 0x542   :  { %v427_v16 = vpack.c.bf16 %v3775_v14, %v3773_v10  ;;  %v2992_v17 = vpop.f32.mrb[1].mxu0  ;;  %v2998_v19 = vpop.f32.mrb[17].mxu1  ;;  %v529_v20 = vsel %vm210_vm2, %v473_v15, -inf }
 0x543   :  { %v424_v21 = vpop.f32.mrb[2].mxu0  ;;  %530 = vmax.xlane.f32.xlu0 %v529_v20  ;;  %v476_v22 = vpop.f32.mrb[18].mxu1 }
 0x544   :  { %v2993_v23 = vpop.f32.mrb[3].mxu0  ;;  %v2999_v25 = vpop.f32.mrb[19].mxu1 }
 0x549   :  { %v523_v26 = vpop.f32.mrb[4].mxu0 }
 0x54a   :  { %v3004_v27 = vpop.f32.mrb[5].mxu0  ;;  %v532_v29 = vsel %vm210_vm2, %v523_v26, -inf }
 0x54b   :  { %533 = vmax.xlane.f32.xlu1 %v532_v29  ;;  %v526_v30 = vpop.f32.mrb[6].mxu0 }
 0x54c   :  { %v3005_v31 = vpop.f32.mrb[7].mxu0 }
 0x55c   :  { %601 = vrot.lane.b32.xlu1 %v3721_v28, %s3533_s5 }
 0x560   :  { %748 = vrot.lane.b32.xlu1 %v3717_v24, %s3534_s17 }
 0x564   :  { %798 = vrot.lane.b32.xlu1 %v3721_v28, %s3534_s17 }
 0x568   :  { %796 = vrot.lane.b32.xlu1 %v3721_v28, %s3535_s19 }
 0x5d0   :  { %v531_v32 = vpop.xlane.xlu0 %530 }
 0x5d1   :  { %v535_v33 = vsub.f32 %v473_v15, %v531_v32 }
 0x5d3   :  { %v537_v34 = vmul.f32 1.442695, %v535_v33 }
 0x5d5   :  { %3301 = vpow2.f32 %v537_v34 }
 0x5d8   :  { %v534_v35 = vpop.xlane.xlu1 %533 }
 0x5d9   :  { %v536_v36 = vsub.f32 %v523_v26, %v534_v35 }
 0x5db   :  { %v539_v37 = vmul.f32 1.442695, %v536_v36 }
 0x5dc   :  { %v602_v38 = vpop.permute.xlu1 %601 }
 0x5dd   :  { %3303 = vpow2.f32 %v539_v37  ;;  %v607_v39 = vsel %vm335_vm3, %v602_v38, 0 }
 0x5de   :  { %3013 = vmatpush3.bf16.msra.mxu0 %v607_v39 }
 0x5df   :  { %v3302_v40 = vpop.eup %3301  ;;  %3024 = vmatprep.subr.bf16.mxu0 %v3528_v7 }
 0x5e0   :  { %v541_v41 = vsel %vm210_vm2, %v3302_v40, 0.0  ;;  %v749_v56 = vpop.permute.xlu1 %748 }
 0x5e1   :  { %542 = vadd.xlane.f32.xlu0 %v541_v41  ;;  %v754_v9 = vsel %vm210_vm2, %v749_v56, 0 }
 0x5e4   :  { %v799_v57 = vpop.permute.xlu1 %798 }
 0x5e5   :  { %v804_v58 = vsel %vm210_vm2, %v799_v57, 0 }
 0x5e7   :  { %v3304_v42 = vpop.eup %3303 }
 0x5e8   :  { %v544_v43 = vsel %vm210_vm2, %v3304_v42, 0.0  ;;  %v797_v59 = vpop.permute.xlu1 %796 }
 0x5e9   :  { %545 = vadd.xlane.f32.xlu0 %v544_v43 }
 0x5ff   :  { %553 = vrot.lane.b32.xlu0 %v3717_v24, %s3533_s5 }
 0x603   :  { %746 = vrot.lane.b32.xlu0 %v3717_v24, %s3535_s19 }
 0x66e   :  { %v543_v44 = vpop.xlane.xlu0 %542 }
 0x66f   :  { %3305 = vrcp.f32 %v543_v44 }
 0x676   :  { %v546_v45 = vpop.xlane.xlu0 %545 }
 0x677   :  { %3307 = vrcp.f32 %v546_v45 }
 0x679   :  { %v3306_v46 = vpop.eup %3305 }
 0x67a   :  { %v549_v47 = vmul.f32 %v3306_v46, %v3302_v40  ;;  %v554_v48 = vpop.permute.xlu0 %553 }
 0x67b   :  { %v559_v49 = vsel %vm335_vm3, %v554_v48, 0 }
 0x67c   :  { %3007 = vmatpush3.bf16.msra.mxu1 %v559_v49  ;;  %v551_v50 = vpack.c.bf16 %v549_v47, %v549_v47 }
 0x67d   :  { %3018 = vmatprep.subr.bf16.mxu1 %v3528_v7 }
 0x67e   :  { %v747_v13 = vpop.permute.xlu0 %746 }
 0x67f   :  { %3009 = vmatmul.mubr.msk.bf16.vlgmr.msra.gmra.mrb[20].mxu1 %vm210_vm2, %v551_v50 }
 0x680   :  { %3020 = vmatprep.mubr.msk.bf16.mxu1 %vm3529_vm1, %v3528_v7  ;;  %3019 = vmatpush3.bf16.msra.mxu1 %v656_v61 }
 0x681   :  { %v3308_v51 = vpop.eup %3307  ;;  %3030 = vmatprep.subr.bf16.mxu1 %v3528_v7 }
 0x682   :  { %v550_v53 = vmul.f32 %v3308_v51, %v3304_v42 }
 0x684   :  { %v552_v54 = vpack.c.bf16 %v550_v53, %v550_v53 }
 0x686   :  { %3015 = vmatmul.mubr.msk.bf16.vlgmr.msra.gmra.mrb[8].mxu0 %vm210_vm2, %v552_v54 }
 0x687   :  { %3025 = vmatpush3.bf16.msra.mxu0 %v703_v55  ;;  %3026 = vmatprep.mubr.msk.bf16.mxu0 %vm3529_vm1, %v3528_v7 }
 0x688   :  { %3036 = vmatprep.subr.bf16.mxu0 %v3528_v7 }
 0x68e   :  { %3027 = vmatmul.mubr.msk.bf16.vlgmr.msra.gmra.mrb[12].mxu0 %vm210_vm2, %v427_v16 }
 0x68f   :  { %3038 = vmatprep.mubr.msk.bf16.mxu0 %vm3529_vm1, %v3528_v7 }
 0x690   :  { %3037 = vmatpush3.bf16.xpose.msra.mxu0 %v804_v58 }
 0x691   :  { %3048 = vmatprep.subr.bf16.mxu0 %v3528_v7 }
 0x697   :  { %3039 = vmatmul.mubr.msk.bf16.vlgmr.msra.gmra.mrb[16].mxu0 %vm210_vm2, %v797_v59 }
 0x698   :  { %3050 = vmatprep.mubr.msk.bf16.mxu0 %vm3529_vm1, %v3528_v7 }
 0x752   :  { %v595_v62 = vpop.f32.mrb[20].mxu1 }
 0x753   :  { %v3010_v63 = vpop.f32.mrb[21].mxu1 }
 0x754   :  { %v598_v2 = vpop.f32.mrb[22].mxu1 }
 0x755   :  { %v3011_v3 = vpop.f32.mrb[23].mxu1  ;;  %v968_v2 = vld [vmem:[#allocation7 + $0x8] sm:$0xf] }
 0x756   :  { %v973_v3 = vsel %vm335_vm3, %v968_v2, 0 }
 0x759   :  { %v643_v4 = vpop.f32.mrb[8].mxu0 }
 0x75a   :  { %v649_v5 = vpack.c.bf16 %v643_v4, %v595_v62  ;;  %v3016_v6 = vpop.f32.mrb[9].mxu0 }
 0x75b   :  { %v646_v8 = vpop.f32.mrb[10].mxu0 }
 0x75c   :  { %v3017_v10 = vpop.f32.mrb[11].mxu0  ;;  %3021 = vmatmul.mubr.msk.bf16.vlgmr.msra.gmra.mrb[24].mxu1 %vm210_vm2, %v649_v5 }
 0x75d   :  { %3031 = vmatpush3.bf16.xpose.msra.mxu1 %v754_v9  ;;  %3032 = vmatprep.mubr.msk.bf16.mxu1 %vm3529_vm1, %v3528_v7 }
 0x75e   :  { %3042 = vmatprep.subr.bf16.mxu1 %v3528_v7 }
 0x761   :  { %v739_v11 = vpop.f32.mrb[12].mxu0 }
 0x762   :  { %v3028_v12 = vpop.f32.mrb[13].mxu0 }
 0x763   :  { %v742_v14 = vpop.f32.mrb[14].mxu0 }
 0x764   :  { %v3029_v15 = vpop.f32.mrb[15].mxu0  ;;  %3033 = vmatmul.mubr.msk.bf16.vlgmr.msra.gmra.mrb[28].mxu1 %vm210_vm2, %v747_v13 }
 0x765   :  { %3044 = vmatprep.mubr.msk.bf16.mxu1 %vm3529_vm1, %v3528_v7 }
 0x76a   :  { %v840_v16 = vpop.f32.mrb[16].mxu0 }
 0x76b   :  { %v3040_v17 = vpop.f32.mrb[17].mxu0  ;;  %v849_v19 = vsel %vm210_vm2, %v840_v16, -inf }
 0x76c   :  { %850 = vmax.xlane.f32.xlu1 %v849_v19  ;;  %v843_v20 = vpop.f32.mrb[18].mxu0 }
 0x76d   :  { %v3041_v21 = vpop.f32.mrb[19].mxu0 }
 0x77d   :  { %918 = vrot.lane.b32.xlu1 %v3721_v28, %s3536_s4 }
 0x781   :  { %1020 = vrot.lane.b32.xlu1 %v3717_v24, %s3537_s20 }
 0x785   :  { %1070 = vrot.lane.b32.xlu1 %v3721_v28, %s3537_s20 }
 0x789   :  { %1068 = vrot.lane.b32.xlu1 %v3721_v28, %s3538_s21 }
 0x7f9   :  { %v851_v22 = vpop.xlane.xlu1 %850 }
 0x7fa   :  { %v853_v26 = vsub.f32 %v840_v16, %v851_v22 }
 0x7fc   :  { %v856_v27 = vmul.f32 1.442695, %v853_v26 }
 0x7fd   :  { %v919_v23 = vpop.permute.xlu1 %918 }
 0x7fe   :  { %v924_v25 = vsel %vm335_vm3, %v919_v23, 0  ;;  %3309 = vpow2.f32 %v856_v27 }
 0x7ff   :  { %3049 = vmatpush3.bf16.msra.mxu0 %v924_v25 }
 0x800   :  { %3060 = vmatprep.subr.bf16.mxu0 %v3528_v7 }
 0x801   :  { %v1021_v50 = vpop.permute.xlu1 %1020 }
 0x802   :  { %v1026_v52 = vsel %vm210_vm2, %v1021_v50, 0 }
 0x805   :  { %v1071_v10 = vpop.permute.xlu1 %1070 }
 0x806   :  { %v1076_v15 = vsel %vm210_vm2, %v1071_v10, 0 }
 0x808   :  { %v3310_v38 = vpop.eup %3309 }
 0x809   :  { %v861_v41 = vsel %vm210_vm2, %v3310_v38, 0.0  ;;  %v1069_v17 = vpop.permute.xlu1 %1068 }
 0x82f   :  { %v692_v29 = vpop.f32.mrb[24].mxu1 }
 0x830   :  { %v3837_v30 = vadd.f32 %v739_v11, %v692_v29  ;;  %v3022_v31 = vpop.f32.mrb[25].mxu1 }
 0x831   :  { %v695_v32 = vpop.f32.mrb[26].mxu1 }
 0x832   :  { %v3839_v33 = vadd.f32 %v742_v14, %v695_v32  ;;  %v3023_v34 = vpop.f32.mrb[27].mxu1 }
 0x837   :  { %v790_v35 = vpop.f32.mrb[28].mxu1 }
 0x838   :  { %v3034_v36 = vpop.f32.mrb[29].mxu1  ;;  %v846_v37 = vsel %vm210_vm2, %v790_v35, -inf }
 0x839   :  { %847 = vmax.xlane.f32.xlu0 %v846_v37  ;;  %v793_v39 = vpop.f32.mrb[30].mxu1 }
 0x83a   :  { %v3035_v40 = vpop.f32.mrb[31].mxu1 }
 0x83d   :  { %862 = vadd.xlane.f32.xlu0 %v861_v41 }
 0x8c6   :  { %v848_v42 = vpop.xlane.xlu0 %847 }
 0x8c7   :  { %v852_v43 = vsub.f32 %v790_v35, %v848_v42 }
 0x8c9   :  { %v854_v44 = vmul.f32 1.442695, %v852_v43 }
 0x8ca   :  { %v863_v45 = vpop.xlane.xlu0 %862 }
 0x8cb   :  { %3311 = vpow2.f32 %v854_v44 }
 0x8cc   :  { %3313 = vrcp.f32 %v863_v45 }
 0x8d5   :  { %v3312_v46 = vpop.eup %3311 }
 0x8d6   :  { %v3314_v47 = vpop.eup %3313  ;;  %v858_v48 = vsel %vm210_vm2, %v3312_v46, 0.0 }
 0x8d7   :  { %v867_v49 = vmul.f32 %v3314_v47, %v3310_v38  ;;  %859 = vadd.xlane.f32.xlu0 %v858_v48 }
 0x8d9   :  { %v869_v51 = vpack.c.bf16 %v867_v49, %v867_v49 }
 0x8db   :  { %3051 = vmatmul.mubr.msk.bf16.vlgmr.msra.gmra.mrb[20].mxu0 %vm210_vm2, %v869_v51 }
 0x8dc   :  { %3061 = vmatpush3.bf16.xpose.msra.mxu0 %v1026_v52  ;;  %3062 = vmatprep.mubr.msk.bf16.mxu0 %vm3529_vm1, %v3528_v7  ;;  %v1240_v52 = vld [vmem:[#allocation7 + $0xc] sm:$0xf] }
 0x8dd   :  { %3072 = vmatprep.subr.bf16.mxu0 %v3528_v7 }
 0x8ed   :  { %870 = vrot.lane.b32.xlu0 %v3717_v24, %s3536_s4 }
 0x8f1   :  { %1018 = vrot.lane.b32.xlu0 %v3717_v24, %s3538_s21 }
 0x964   :  { %v860_v53 = vpop.xlane.xlu0 %859 }
 0x965   :  { %3315 = vrcp.f32 %v860_v53  ;;  %v1245_v53 = vsel %vm335_vm3, %v1240_v52, 0 }
 0x968   :  { %v871_v54 = vpop.permute.xlu0 %870 }
 0x969   :  { %v876_v55 = vsel %vm335_vm3, %v871_v54, 0  ;;  %v3897_v54 = vld [vmem:[%s4211_s1] sm:$0xff] }
 0x96a   :  { %3043 = vmatpush3.bf16.msra.mxu1 %v876_v55  ;;  %v3902_v55 = vld [vmem:[%s4211_s1 + $0x8] sm:$0xff] }
 0x96b   :  { %3054 = vmatprep.subr.bf16.mxu1 %v3528_v7 }
 0x96c   :  { %v1019_v56 = vpop.permute.xlu0 %1018 }
 0x96d   :  { %3063 = vmatmul.mubr.msk.bf16.vlgmr.msra.gmra.mrb[24].mxu0 %vm210_vm2, %v1019_v56  ;;  %v114_v56 = vld [vmem:[%s4211_s1 + $0x18] sm:$0xff] }
 0x96e   :  { %3074 = vmatprep.mubr.msk.bf16.mxu0 %vm3529_vm1, %v3528_v7 }
 0x96f   :  { %v3316_v57 = vpop.eup %3315 }
 0x970   :  { %v866_v58 = vmul.f32 %v3316_v57, %v3312_v46  ;;  %v1310_v57 = vmul.f32 %v3897_v54, %v3897_v54 }
 0x972   :  { %v868_v59 = vpack.c.bf16 %v866_v58, %v866_v58  ;;  %v1311_v58 = vmul.f32 %v3902_v55, %v3902_v55 }
 0x974   :  { %3045 = vmatmul.mubr.msk.bf16.vlgmr.msra.gmra.mrb[32].mxu1 %vm210_vm2, %v868_v59  ;;  %v1313_v59 = vmul.f32 %v114_v56, %v114_v56 }
 0x975   :  { %3056 = vmatprep.mubr.msk.bf16.mxu1 %vm3529_vm1, %v3528_v7  ;;  %3055 = vmatpush3.bf16.msra.mxu1 %v973_v3 }
 0x976   :  { %3066 = vmatprep.subr.bf16.mxu1 %v3528_v7  ;;  %v1323_v2 = vsel %vm120_vm0, %v1313_v59, 0.0 }
 0x9ae   :  { %v960_v60 = vpop.f32.mrb[20].mxu0 }
 0x9af   :  { %v3052_v61 = vpop.f32.mrb[21].mxu0 }
 0x9b0   :  { %v963_v62 = vpop.f32.mrb[22].mxu0 }
 0x9b1   :  { %v3053_v63 = vpop.f32.mrb[23].mxu0  ;;  %v1314_v62 = vsel %vm120_vm0, %v1310_v57, 0.0 }
 0x9b2   :  { %v1317_v63 = vsel %vm120_vm0, %v1311_v58, 0.0 }
 0xa40   :  { %v1062_v4 = vpop.f32.mrb[24].mxu0 }
 0xa41   :  { %v3064_v5 = vpop.f32.mrb[25].mxu0  ;;  %v1118_v6 = vsel %vm210_vm2, %v1062_v4, -inf }
 0xa42   :  { %1119 = vmax.xlane.f32.xlu0 %v1118_v6  ;;  %v1065_v8 = vpop.f32.mrb[26].mxu0 }
 0xa43   :  { %v3065_v9 = vpop.f32.mrb[27].mxu0 }
 0xa47   :  { %v912_v11 = vpop.f32.mrb[32].mxu1 }
 0xa48   :  { %v966_v12 = vpack.c.bf16 %v960_v60, %v912_v11  ;;  %v3046_v13 = vpop.f32.mrb[33].mxu1  ;;  %v113_v60 = vld [vmem:[%s4211_s1 + $0x10] sm:$0xff] }
 0xa49   :  { %v915_v14 = vpop.f32.mrb[34].mxu1  ;;  %v1312_v61 = vmul.f32 %v113_v60, %v113_v60 }
 0xa4a   :  { %v3047_v16 = vpop.f32.mrb[35].mxu1  ;;  %3057 = vmatmul.mubr.msk.bf16.vlgmr.msra.gmra.mrb[36].mxu1 %vm210_vm2, %v966_v12 }
 0xa4b   :  { %3067 = vmatpush3.bf16.xpose.msra.mxu1 %v1076_v15  ;;  %3068 = vmatprep.mubr.msk.bf16.mxu1 %vm3529_vm1, %v3528_v7  ;;  %v1320_v3 = vsel %vm120_vm0, %v1312_v61, 0.0 }
 0xa4c   :  { %3078 = vmatprep.subr.bf16.mxu1 %v3528_v7 }
 0xa52   :  { %3069 = vmatmul.mubr.msk.bf16.vlgmr.msra.gmra.mrb[40].mxu1 %vm210_vm2, %v1069_v17 }
 0xa53   :  { %3080 = vmatprep.mubr.msk.bf16.mxu1 %vm3529_vm1, %v3528_v7 }
 0xacf   :  { %v1120_v19 = vpop.xlane.xlu0 %1119 }
 0xad0   :  { %v1124_v20 = vsub.f32 %v1062_v4, %v1120_v19 }
 0xad2   :  { %v1126_v21 = vmul.f32 1.442695, %v1124_v20 }
 0xad4   :  { %3317 = vpow2.f32 %v1126_v21 }
 0xade   :  { %v3318_v22 = vpop.eup %3317 }
 0xadf   :  { %v1130_v23 = vsel %vm210_vm2, %v3318_v22, 0.0 }
 0xae0   :  { %1131 = vadd.xlane.f32.xlu0 %v1130_v23 }
 0xb1d   :  { %v1009_v25 = vpop.f32.mrb[36].mxu1 }
 0xb1e   :  { %v3874_v26 = vadd.f32 %v1009_v25, %v3837_v30  ;;  %v3058_v27 = vpop.f32.mrb[37].mxu1 }
 0xb1f   :  { %v1012_v29 = vpop.f32.mrb[38].mxu1 }
 0xb20   :  { %v3877_v31 = vadd.f32 %v1012_v29, %v3839_v33  ;;  %v3059_v32 = vpop.f32.mrb[39].mxu1 }
 0xb25   :  { %v1112_v34 = vpop.f32.mrb[40].mxu1 }
 0xb26   :  { %v3070_v35 = vpop.f32.mrb[41].mxu1  ;;  %v1121_v36 = vsel %vm210_vm2, %v1112_v34, -inf }
 0xb27   :  { %1122 = vmax.xlane.f32.xlu1 %v1121_v36  ;;  %v1115_v37 = vpop.f32.mrb[42].mxu1 }
 0xb28   :  { %v3071_v38 = vpop.f32.mrb[43].mxu1 }
 0xb38   :  { %1190 = vrot.lane.b32.xlu1 %v3721_v28, %s3539_s23 }
 0xb5c   :  { %1315 = vadd.xlane.f32.xlu1 %v1314_v62 }
 0xb60   :  { %1324 = vadd.xlane.f32.xlu1 %v1323_v2 }
 0xb6d   :  { %v1132_v44 = vpop.xlane.xlu0 %1131 }
 0xbb4   :  { %v1123_v39 = vpop.xlane.xlu1 %1122 }
 0xbb5   :  { %v1125_v40 = vsub.f32 %v1112_v34, %v1123_v39 }
 0xbb7   :  { %v1128_v30 = vmul.f32 1.442695, %v1125_v40 }
 0xbb8   :  { %v1191_v41 = vpop.permute.xlu1 %1190 }
 0xbb9   :  { %3319 = vpow2.f32 %v1128_v30  ;;  %v1196_v42 = vsel %vm335_vm3, %v1191_v41, 0 }
 0xbba   :  { %3079 = vmatpush3.bf16.msra.mxu1 %v1196_v42  ;;  %3321 = vrcp.f32 %v1132_v44 }
 0xbbb   :  { %3090 = vmatprep.subr.bf16.mxu1 %v3528_v7 }
 0xbc3   :  { %v3320_v33 = vpop.eup %3319 }
 0xbc4   :  { %v1133_v43 = vsel %vm210_vm2, %v3320_v33, 0.0  ;;  %v3322_v45 = vpop.eup %3321 }
 0xbc5   :  { %1134 = vadd.xlane.f32.xlu0 %v1133_v43  ;;  %v1138_v46 = vmul.f32 %v3322_v45, %v3318_v22  ;;  %v3271_v43 = vld [vmem:[#allocation10] sm:$0xff]  }
 0xbc7   :  { %v1140_v49 = vpack.c.bf16 %v1138_v46, %v1138_v46 }
 0xbdb   :  { %1142 = vrot.lane.b32.xlu0 %v3717_v24, %s3539_s23 }
 0xbe9   :  { %v1316_v15 = vpop.xlane.xlu1 %1315 }
 0xbea   :  { %v1326_v37 = vmul.f32 0.03125, %v1316_v15 }
 0xbec   :  { %v1330_v30 = vadd.f32 1e-06, %v1326_v37 }
 0xbed   :  { %v1325_v21 = vpop.xlane.xlu1 %1324 }
 0xbee   :  { %v1329_v34 = vmul.f32 0.03125, %v1325_v21 }
 0xbf0   :  { %v1333_v40 = vadd.f32 1e-06, %v1329_v34 }
 0xbfa   :  { %1318 = vadd.xlane.f32.xlu0 %v1317_v63 }
 0xbfe   :  { %1321 = vadd.xlane.f32.xlu0 %v1320_v3 }
 0xc52   :  { %v1135_v28 = vpop.xlane.xlu0 %1134 }
 0xc53   :  { %3323 = vrcp.f32 %v1135_v28 }
 0xc56   :  { %v1143_v47 = vpop.permute.xlu0 %1142 }
 0xc57   :  { %v1148_v48 = vsel %vm335_vm3, %v1143_v47, 0  ;;  %v3272_v47 = vld [vmem:[#allocation10 + $0x8] sm:$0xff]  }
 0xc58   :  { %3073 = vmatpush3.bf16.msra.mxu0 %v1148_v48  ;;  %v2818_v48 = vld [vmem:[%s4213_s3] ss:$0 sm:$0xff] }
 0xc59   :  { %3084 = vmatprep.subr.bf16.mxu0 %v3528_v7 }
 0xc5b   :  { %3075 = vmatmul.mubr.msk.bf16.vlgmr.msra.gmra.mrb[28].mxu0 %vm210_vm2, %v1140_v49 }
 0xc5c   :  { %3086 = vmatprep.mubr.msk.bf16.mxu0 %vm3529_vm1, %v3528_v7  ;;  %3085 = vmatpush3.bf16.msra.mxu0 %v1245_v53 }
 0xc5d   :  { %v3324_v50 = vpop.eup %3323  ;;  %3098 = vmatprep.subr.bf16.mxu0 %v3271_v43 }
 0xc5e   :  { %v1139_v24 = vmul.f32 %v3324_v50, %v3320_v33 }
 0xc60   :  { %v1141_v51 = vpack.c.bf16 %v1139_v24, %v1139_v24 }
 0xc62   :  { %3081 = vmatmul.mubr.msk.bf16.vlgmr.msra.gmra.mrb[44].mxu1 %vm210_vm2, %v1141_v51 }
 0xc63   :  { %3094 = vmatprep.mubr.msk.bf16.mxu1 %vm3529_vm1, %v3528_v7 }
 0xc87   :  { %v1319_v14 = vpop.xlane.xlu0 %1318 }
 0xc88   :  { %v1327_v23 = vmul.f32 0.03125, %v1319_v14 }
 0xc8b   :  { %v1322_v17 = vpop.xlane.xlu0 %1321 }
 0xc8c   :  { %v1328_v32 = vmul.f32 0.03125, %v1322_v17 }
 0xd2e   :  { %v1184_v4 = vpop.f32.mrb[28].mxu0 }
 0xd2f   :  { %v3076_v5 = vpop.f32.mrb[29].mxu0 }
 0xd30   :  { %v1187_v6 = vpop.f32.mrb[30].mxu0 }
 0xd31   :  { %v3077_v8 = vpop.f32.mrb[31].mxu0 }
 0xd35   :  { %v1232_v9 = vpop.f32.mrb[44].mxu1 }
 0xd36   :  { %v1238_v10 = vpack.c.bf16 %v1232_v9, %v1184_v4  ;;  %v3082_v11 = vpop.f32.mrb[45].mxu1 }
 0xd37   :  { %v1235_v12 = vpop.f32.mrb[46].mxu1 }
 0xd38   :  { %v3083_v13 = vpop.f32.mrb[47].mxu1  ;;  %3087 = vmatmul.mubr.msk.bf16.vlgmr.msra.gmra.mrb[32].mxu0 %vm210_vm2, %v1238_v10 }
 0xd39   :  { %3099 = vmatpush3.bf16.msra.mxu0 %v3271_v43 }
 0xd3a   :  { %3100 = vmatprep.subr.bf16.mxu0 %v3272_v47 }
 0xd3d   :  { %3101 = vmatpush3.bf16.msra.mxu0 %v3272_v47 }
 0xd3e   :  { %3112 = vmatprep.subr.bf16.mxu0 %v3528_v7 }
 0xe0b   :  { %v1281_v16 = vpop.f32.mrb[32].mxu0 }
 0xe0c   :  { %v1288_v19 = vadd.f32 %v1281_v16, %v3874_v26  ;;  %v3088_v20 = vpop.f32.mrb[33].mxu0  ;;  %v1331_v26 = vadd.f32 1e-06, %v1327_v23 }
 0xe0d   :  { %v1284_v22 = vpop.f32.mrb[34].mxu0 }
 0xe0e   :  { %v3921_v25 = vadd.f32 %v1288_v19, %v3684_v0  ;;  %v1289_v27 = vadd.f32 %v1284_v22, %v3877_v31  ;;  %v3089_v29 = vpop.f32.mrb[35].mxu0  ;;  %v1332_v0 = vadd.f32 1e-06, %v1328_v32  ;;  %3325 = vrsqrt.f32 %v1331_v26 }
 0xe10   :  { %v3925_v35 = vadd.f32 %v1289_v27, %v3689_v1  ;;  %v1292_v36 = vmul.f32 %v3921_v25, %v3921_v25  ;;  %3327 = vrsqrt.f32 %v1332_v0 }
 0xe11   :  { %3329 = vrsqrt.f32 %v1333_v40 }
 0xe12   :  { %v1294_v38 = vsel %vm120_vm0, %v1292_v36, 0.0  ;;  %v1293_v39 = vmul.f32 %v3925_v35, %v3925_v35  ;;  %3331 = vrsqrt.f32 %v1330_v30 }
 0xe13   :  { %1295 = vadd.xlane.f32.xlu0 %v1294_v38 }
 0xe14   :  { %v1297_v31 = vsel %vm120_vm0, %v1293_v39, 0.0 }
 0xe15   :  { %1298 = vadd.xlane.f32.xlu1 %v1297_v31 }
 0xe18   :  { %v3326_v1 = vpop.eup %3325 }
 0xe19   :  { %v1339_v46 = vmul.f32 %v3326_v1, %v3902_v55  ;;  %v3274_v55 = vld [vmem:[#allocation8 + $0x8] sm:$0xff]  }
 0xe1a   :  { %v3328_v41 = vpop.eup %3327 }
 0xe1b   :  { %v3330_v42 = vpop.eup %3329  ;;  %v1340_v44 = vmul.f32 %v3328_v41, %v113_v60  ;;  %v1349_v50 = vmul.f32 %v2818_v48, %v1339_v46 }
 0xe1c   :  { %v3332_v33 = vpop.eup %3331  ;;  %v1341_v45 = vmul.f32 %v3330_v42, %v114_v56 }
 0xe1d   :  { %v1338_v28 = vmul.f32 %v3332_v33, %v3897_v54  ;;  %v1350_v24 = vmul.f32 %v2818_v48, %v1340_v44  ;;  %v3273_v54 = vld [vmem:[#allocation8] sm:$0xff]  }
 0xe1e   :  { %v1351_v51 = vmul.f32 %v2818_v48, %v1341_v45  ;;  %3091 = vmatpush3.bf16.msra.mxu1 %v3273_v54 }
 0xe1f   :  { %v1348_v49 = vmul.f32 %v2818_v48, %v1338_v28  ;;  %3092 = vmatprep.subr.bf16.mxu1 %v3528_v7 }
 0xe20   :  { %v1414_v53 = vpack.c.bf16 %v1351_v51, %v1350_v24 }
 0xe21   :  { %v1413_v52 = vpack.c.bf16 %v1349_v50, %v1348_v49 }
 0xe22   :  { %3093 = vmatpush3.bf16.msra.mxu1 %v3274_v55 }
 0xe23   :  { %3102 = vmatprep.mubr.msk.bf16.mxu0 %vm120_vm0, %v1413_v52  ;;  %3106 = vmatprep.subr.bf16.mxu1 %v3528_v7 }
 0xe24   :  { %3103 = vmatmul.mubr.msk.bf16.vlgmr.msra.gmra.mrb[36].mxu0 %vm120_vm0, %v1414_v53 }
 0xe25   :  { %3114 = vmatprep.mubr.msk.bf16.mxu0 %vm3529_vm1, %v3528_v7 }
 0xea0   :  { %v1296_v56 = vpop.xlane.xlu0 %1295 }
 0xea1   :  { %v1300_v57 = vmul.f32 0.03125, %v1296_v56 }
 0xea2   :  { %v1299_v58 = vpop.xlane.xlu1 %1298 }
 0xea3   :  { %v1302_v59 = vadd.f32 1e-06, %v1300_v57  ;;  %v1301_v60 = vmul.f32 0.03125, %v1299_v58 }
 0xea5   :  { %3333 = vrsqrt.f32 %v1302_v59  ;;  %v1303_v61 = vadd.f32 1e-06, %v1301_v60 }
 0xea7   :  { %3335 = vrsqrt.f32 %v1303_v61 }
 0xeaf   :  { %v3334_v62 = vpop.eup %3333 }
 0xeb0   :  { %v1306_v63 = vmul.f32 %v3334_v62, %v3921_v25 }
 0xeb1   :  { %v3336_v2 = vpop.eup %3335 }
 0xeb2   :  { %v1307_v3 = vmul.f32 %v3336_v2, %v3925_v35  ;;  %v1308_v4 = vmul.f32 %v3709_v18, %v1306_v63 }
 0xeb4   :  { %v1309_v5 = vmul.f32 %v3709_v18, %v1307_v3 }
 0xeb6   :  { %v1352_v6 = vpack.c.bf16 %v1309_v5, %v1308_v4 }
 0xeb8   :  { %3095 = vmatmul.mubr.msk.bf16.vlgmr.msra.gmra.mrb[48].mxu1 %vm120_vm0, %v1352_v6 }
 0xeb9   :  { %3108 = vmatprep.mubr.msk.bf16.mxu1 %vm3529_vm1, %v3528_v7 }
 0xef7   :  { %v3104_v8 = vpop.f32.mrb[36].mxu0 }
 0xef8   :  { %v1471_v9 = vpop.f32.mrb[37].mxu0 }
 0xef9   :  { %v3105_v10 = vpop.f32.mrb[38].mxu0 }
 0xefa   :  { %v3952_v11 = vpack.c.bf16 %v3105_v10, %v3104_v8  ;;  %v1474_v12 = vpop.f32.mrb[39].mxu0 }
 0xefb   :  { %v3954_v13 = vpack.c.bf16 %v1474_v12, %v1471_v9 }
 0xefc   :  { %v1540_v14 = vsel %vm210_vm2, %v3952_v11, 0 }
 0xefd   :  { %v1494_v18 = vsel %vm210_vm2, %v3954_v13, 0  ;;  %3113 = vmatpush3.bf16.xpose.msra.mxu0 %v1540_v14 }
 0xefe   :  { %3107 = vmatpush3.bf16.xpose.msra.mxu1 %v1494_v18  ;;  %3124 = vmatprep.subr.bf16.mxu0 %v3528_v7 }
 0xeff   :  { %3118 = vmatprep.subr.bf16.mxu1 %v3528_v7 }
 0xf8b   :  { %v1406_v15 = vpop.f32.mrb[48].mxu1 }
 0xf8c   :  { %v3962_v16 = vpack.c.bf16 %v1406_v15, %v1406_v15  ;;  %v3096_v17 = vpop.f32.mrb[49].mxu1 }
 0xf8d   :  { %v1409_v19 = vpop.f32.mrb[50].mxu1 }
 0xf8e   :  { %v3964_v20 = vpack.c.bf16 %v1409_v19, %v1409_v19  ;;  %v3097_v21 = vpop.f32.mrb[51].mxu1  ;;  %3109 = vmatmul.mubr.msk.bf16.vlgmr.msra.gmra.mrb[52].mxu1 %vm210_vm2, %v3962_v16 }
 0xf8f   :  { %3120 = vmatprep.mubr.msk.bf16.mxu1 %vm3529_vm1, %v3528_v7 }
 0xf90   :  { %3115 = vmatmul.mubr.msk.bf16.vlgmr.msra.gmra.mrb[40].mxu0 %vm210_vm2, %v3964_v20 }
 0xf91   :  { %3126 = vmatprep.mubr.msk.bf16.mxu0 %vm3529_vm1, %v3528_v7 }
0x1061   :  { %v1530_v22 = vpop.f32.mrb[52].mxu1 }
0x1062   :  { %v3110_v23 = vpop.f32.mrb[53].mxu1  ;;  %v1583_v27 = vsel %vm1582_vm4, %v1530_v22, -inf }
0x1063   :  { %v1576_v29 = vpop.f32.mrb[40].mxu0  ;;  %1584 = vmax.xlane.f32.xlu0 %v1583_v27  ;;  %v1533_v32 = vpop.f32.mrb[54].mxu1 }
0x1064   :  { %v3111_v34 = vpop.f32.mrb[55].mxu1  ;;  %v3116_v36 = vpop.f32.mrb[41].mxu0  ;;  %v1586_v37 = vsel %vm1582_vm4, %v1576_v29, -inf }
0x1065   :  { %1587 = vmax.xlane.f32.xlu1 %v1586_v37  ;;  %v1579_v26 = vpop.f32.mrb[42].mxu0 }
0x1066   :  { %v3117_v38 = vpop.f32.mrb[43].mxu0 }
0x1076   :  { %1655 = vrot.lane.b32.xlu1 %v3952_v11, %s3530_s14 }
0x107a   :  { %1706 = vrot.lane.b32.xlu1 %v3954_v13, %s3532_s13 }
0x10f0   :  { %v1585_v39 = vpop.xlane.xlu0 %1584 }
0x10f1   :  { %v1589_v0 = vsub.f32 %v1530_v22, %v1585_v39 }
0x10f2   :  { %v1588_v40 = vpop.xlane.xlu1 %1587 }
0x10f3   :  { %v1591_v31 = vmul.f32 1.442695, %v1589_v0  ;;  %v1590_v30 = vsub.f32 %v1576_v29, %v1588_v40 }
0x10f5   :  { %3337 = vpow2.f32 %v1591_v31  ;;  %v1593_v1 = vmul.f32 1.442695, %v1590_v30  ;;  %v2834_v31 = vld [vmem:[%s4219_s9 + $0x4] sm:$0xf] }
0x10f6   :  { %v1656_v41 = vpop.permute.xlu1 %1655 }
0x10f7   :  { %3339 = vpow2.f32 %v1593_v1  ;;  %3125 = vmatpush3.bf16.msra.mxu0 %v1656_v41  ;;  %v1928_v41 = vsel %vm335_vm3, %v2834_v31, 0 }
0x10f8   :  { %3136 = vmatprep.subr.bf16.mxu0 %v3528_v7 }
0x10fa   :  { %v1707_v45 = vpop.permute.xlu1 %1706 }
0x10fb   :  { %v1712_v53 = vsel %vm210_vm2, %v1707_v45, 0 }
0x10ff   :  { %v3338_v42 = vpop.eup %3337 }
0x1100   :  { %v1595_v33 = vsel %vm1582_vm4, %v3338_v42, 0.0 }
0x1101   :  { %v3340_v43 = vpop.eup %3339  ;;  %1596 = vadd.xlane.f32.xlu0 %v1595_v33  ;;  %v1702_v33 = vld [vmem:[%s4219_s9] sm:$0xf] }
0x1102   :  { %v1598_v44 = vsel %vm1582_vm4, %v3340_v43, 0.0  ;;  %v1975_v45 = vsel %vm335_vm3, %v1702_v33, 0 }
0x1103   :  { %1599 = vadd.xlane.f32.xlu1 %v1598_v44 }
0x1114   :  { %1757 = vrot.lane.b32.xlu1 %v3952_v11, %s3532_s13 }
0x1117   :  { %1608 = vrot.lane.b32.xlu0 %v3954_v13, %s3530_s14 }
0x1118   :  { %1755 = vrot.lane.b32.xlu1 %v3964_v20, %s3532_s13 }
0x111b   :  { %1704 = vrot.lane.b32.xlu0 %v3962_v16, %s3532_s13 }
0x118e   :  { %v1597_v28 = vpop.xlane.xlu0 %1596 }
0x118f   :  { %3341 = vrcp.f32 %v1597_v28 }
0x1190   :  { %v1600_v46 = vpop.xlane.xlu1 %1599 }
0x1191   :  { %3343 = vrcp.f32 %v1600_v46 }
0x1192   :  { %v1609_v47 = vpop.permute.xlu0 %1608 }
0x1193   :  { %3119 = vmatpush3.bf16.msra.mxu1 %v1609_v47 }
0x1194   :  { %3130 = vmatprep.subr.bf16.mxu1 %v3528_v7  ;;  %v1758_v52 = vpop.permute.xlu1 %1757 }
0x1195   :  { %v1763_v55 = vsel %vm210_vm2, %v1758_v52, 0 }
0x1196   :  { %v1705_v56 = vpop.permute.xlu0 %1704 }
0x1198   :  { %v1756_v57 = vpop.permute.xlu1 %1755 }
0x1199   :  { %v3342_v48 = vpop.eup %3341 }
0x119a   :  { %v1603_v49 = vmul.f32 %v3342_v48, %v3338_v42 }
0x119b   :  { %v3344_v50 = vpop.eup %3343 }
0x119c   :  { %v1604_v24 = vmul.f32 %v3344_v50, %v3340_v43  ;;  %v1605_v51 = vpack.c.bf16 %v1603_v49, %v1603_v49 }
0x119e   :  { %3121 = vmatmul.mubr.msk.bf16.vlgmr.msra.gmra.mrb[56].mxu1 %vm1582_vm4, %v1605_v51  ;;  %v1606_v54 = vpack.c.bf16 %v1604_v24, %v1604_v24 }
0x119f   :  { %3131 = vmatpush3.bf16.xpose.msra.mxu1 %v1712_v53  ;;  %3132 = vmatprep.mubr.msk.bf16.mxu1 %vm3529_vm1, %v3528_v7 }
0x11a0   :  { %3127 = vmatmul.mubr.msk.bf16.vlgmr.msra.gmra.mrb[44].mxu0 %vm1582_vm4, %v1606_v54  ;;  %3142 = vmatprep.subr.bf16.mxu1 %v3528_v7 }
0x11a1   :  { %3137 = vmatpush3.bf16.xpose.msra.mxu0 %v1763_v55  ;;  %3138 = vmatprep.mubr.msk.bf16.mxu0 %vm3529_vm1, %v3528_v7 }
0x11a2   :  { %3148 = vmatprep.subr.bf16.mxu0 %v3528_v7 }
0x11a6   :  { %3133 = vmatmul.mubr.msk.bf16.vlgmr.msra.gmra.mrb[60].mxu1 %vm210_vm2, %v1705_v56 }
0x11a7   :  { %3144 = vmatprep.mubr.msk.bf16.mxu1 %vm3529_vm1, %v3528_v7 }
0x11a8   :  { %3139 = vmatmul.mubr.msk.bf16.vlgmr.msra.gmra.mrb[48].mxu0 %vm210_vm2, %v1756_v57 }
0x11a9   :  { %3150 = vmatprep.mubr.msk.bf16.mxu0 %vm3529_vm1, %v3528_v7 }
0x1271   :  { %v4008_v58 = vpop.f32.mrb[56].mxu1 }
0x1272   :  { %v3122_v59 = vpop.f32.mrb[57].mxu1 }
0x1273   :  { %v1651_v60 = vpop.f32.mrb[58].mxu1  ;;  %v4010_v61 = vpop.f32.mrb[44].mxu0 }
0x1274   :  { %v1701_v62 = vpack.c.bf16 %v4010_v61, %v4008_v58  ;;  %v3123_v63 = vpop.f32.mrb[59].mxu1  ;;  %v3128_v2 = vpop.f32.mrb[45].mxu0 }
0x1275   :  { %v1698_v3 = vpop.f32.mrb[46].mxu0 }
0x1276   :  { %v3129_v4 = vpop.f32.mrb[47].mxu0 }
0x1279   :  { %v1748_v5 = vpop.f32.mrb[60].mxu1 }
0x127a   :  { %v3134_v6 = vpop.f32.mrb[61].mxu1  ;;  %v1805_v8 = vsel %vm1582_vm4, %v1748_v5, -inf }
0x127b   :  { %v1799_v9 = vpop.f32.mrb[48].mxu0  ;;  %1806 = vmax.xlane.f32.xlu0 %v1805_v8  ;;  %v1751_v10 = vpop.f32.mrb[62].mxu1 }
0x127c   :  { %v3135_v12 = vpop.f32.mrb[63].mxu1  ;;  %v3140_v14 = vpop.f32.mrb[49].mxu0  ;;  %v1808_v18 = vsel %vm1582_vm4, %v1799_v9, -inf }
0x127d   :  { %1809 = vmax.xlane.f32.xlu1 %v1808_v18  ;;  %v1802_v15 = vpop.f32.mrb[50].mxu0 }
0x127e   :  { %v3141_v17 = vpop.f32.mrb[51].mxu0 }
0x128e   :  { %1875 = vrot.lane.b32.xlu1 %v3952_v11, %s3531_s2 }
0x1292   :  { %2020 = vrot.lane.b32.xlu1 %v3954_v13, %s3535_s19 }
0x1296   :  { %2070 = vrot.lane.b32.xlu1 %v3952_v11, %s3535_s19 }
0x129a   :  { %2068 = vrot.lane.b32.xlu1 %v3964_v20, %s3535_s19 }
0x1308   :  { %v1807_v19 = vpop.xlane.xlu0 %1806 }
0x1309   :  { %v1811_v21 = vsub.f32 %v1748_v5, %v1807_v19 }
0x130a   :  { %v1810_v22 = vpop.xlane.xlu1 %1809 }
0x130b   :  { %v1813_v23 = vmul.f32 1.442695, %v1811_v21  ;;  %v1812_v27 = vsub.f32 %v1799_v9, %v1810_v22 }
0x130d   :  { %3345 = vpow2.f32 %v1813_v23  ;;  %v1815_v29 = vmul.f32 1.442695, %v1812_v27 }
0x130e   :  { %v1876_v32 = vpop.permute.xlu1 %1875 }
0x130f   :  { %3347 = vpow2.f32 %v1815_v29  ;;  %3149 = vmatpush3.bf16.msra.mxu0 %v1876_v32 }
0x1310   :  { %3160 = vmatprep.subr.bf16.mxu0 %v3528_v7 }
0x1312   :  { %v2021_v28 = vpop.permute.xlu1 %2020 }
0x1313   :  { %v2026_v56 = vsel %vm210_vm2, %v2021_v28, 0 }
0x1316   :  { %v2071_v46 = vpop.permute.xlu1 %2070 }
0x1317   :  { %v3346_v34 = vpop.eup %3345  ;;  %v2076_v47 = vsel %vm210_vm2, %v2071_v46, 0 }
0x1318   :  { %v1817_v36 = vsel %vm1582_vm4, %v3346_v34, 0.0 }
0x1319   :  { %v3348_v37 = vpop.eup %3347  ;;  %1818 = vadd.xlane.f32.xlu0 %v1817_v36 }
0x131a   :  { %v1820_v26 = vsel %vm1582_vm4, %v3348_v37, 0.0  ;;  %v2069_v48 = vpop.permute.xlu1 %2068 }
0x131d   :  { %1821 = vadd.xlane.f32.xlu0 %v1820_v26 }
0x1333   :  { %1829 = vrot.lane.b32.xlu0 %v3954_v13, %s3531_s2 }
0x1337   :  { %2018 = vrot.lane.b32.xlu0 %v3962_v16, %s3535_s19 }
0x13a6   :  { %v1819_v38 = vpop.xlane.xlu0 %1818 }
0x13a7   :  { %3349 = vrcp.f32 %v1819_v38 }
0x13aa   :  { %v1822_v39 = vpop.xlane.xlu0 %1821 }
0x13ab   :  { %3351 = vrcp.f32 %v1822_v39 }
0x13ae   :  { %v1830_v0 = vpop.permute.xlu0 %1829 }
0x13af   :  { %3143 = vmatpush3.bf16.msra.mxu1 %v1830_v0 }
0x13b0   :  { %3154 = vmatprep.subr.bf16.mxu1 %v3528_v7 }
0x13b1   :  { %v3350_v40 = vpop.eup %3349 }
0x13b2   :  { %v1825_v30 = vmul.f32 %v3350_v40, %v3346_v34  ;;  %v2019_v60 = vpop.permute.xlu0 %2018 }
0x13b4   :  { %v1827_v1 = vpack.c.bf16 %v1825_v30, %v1825_v30 }
0x13b5   :  { %v3352_v42 = vpop.eup %3351 }
0x13b6   :  { %v1826_v43 = vmul.f32 %v3352_v42, %v3348_v37  ;;  %3145 = vmatmul.mubr.msk.bf16.vlgmr.msra.gmra.mrb[64].mxu1 %vm1582_vm4, %v1827_v1 }
0x13b7   :  { %3155 = vmatpush3.bf16.msra.mxu1 %v1928_v41  ;;  %3156 = vmatprep.mubr.msk.bf16.mxu1 %vm3529_vm1, %v3528_v7 }
0x13b8   :  { %v1828_v44 = vpack.c.bf16 %v1826_v43, %v1826_v43  ;;  %3166 = vmatprep.subr.bf16.mxu1 %v3528_v7 }
0x13ba   :  { %3151 = vmatmul.mubr.msk.bf16.vlgmr.msra.gmra.mrb[52].mxu0 %vm1582_vm4, %v1828_v44 }
0x13bb   :  { %3161 = vmatpush3.bf16.msra.mxu0 %v1975_v45  ;;  %3162 = vmatprep.mubr.msk.bf16.mxu0 %vm3529_vm1, %v3528_v7 }
0x13bc   :  { %3172 = vmatprep.subr.bf16.mxu0 %v3528_v7 }
0x13c2   :  { %3163 = vmatmul.mubr.msk.bf16.vlgmr.msra.gmra.mrb[56].mxu0 %vm210_vm2, %v1701_v62 }
0x13c3   :  { %3174 = vmatprep.mubr.msk.bf16.mxu0 %vm3529_vm1, %v3528_v7 }
0x13c4   :  { %3173 = vmatpush3.bf16.xpose.msra.mxu0 %v2076_v47 }
0x13c5   :  { %3184 = vmatprep.subr.bf16.mxu0 %v3528_v7 }
0x13cb   :  { %3175 = vmatmul.mubr.msk.bf16.vlgmr.msra.gmra.mrb[60].mxu0 %vm210_vm2, %v2069_v48  ;;  %v2841_v48 = vld [vmem:[%s4219_s9 + $0x8] sm:$0xf] }
0x13cc   :  { %3186 = vmatprep.mubr.msk.bf16.mxu0 %vm3529_vm1, %v3528_v7 }
0x1489   :  { %v1869_v49 = vpop.f32.mrb[64].mxu1 }
0x148a   :  { %v3146_v50 = vpop.f32.mrb[65].mxu1 }
0x148b   :  { %v1872_v24 = vpop.f32.mrb[66].mxu1 }
0x148c   :  { %v3147_v51 = vpop.f32.mrb[67].mxu1 }
0x148d   :  { %v1915_v52 = vpop.f32.mrb[52].mxu0 }
0x148e   :  { %v1921_v53 = vpack.c.bf16 %v1915_v52, %v1869_v49  ;;  %v3152_v54 = vpop.f32.mrb[53].mxu0  ;;  %v2241_v49 = vsel %vm335_vm3, %v2841_v48, 0 }
0x148f   :  { %v1918_v55 = vpop.f32.mrb[54].mxu0 }
0x1490   :  { %v3153_v57 = vpop.f32.mrb[55].mxu0  ;;  %3157 = vmatmul.mubr.msk.bf16.vlgmr.msra.gmra.mrb[68].mxu1 %vm210_vm2, %v1921_v53 }
0x1491   :  { %3167 = vmatpush3.bf16.xpose.msra.mxu1 %v2026_v56  ;;  %3168 = vmatprep.mubr.msk.bf16.mxu1 %vm3529_vm1, %v3528_v7 }
0x1492   :  { %3178 = vmatprep.subr.bf16.mxu1 %v3528_v7 }
0x1495   :  { %v2011_v58 = vpop.f32.mrb[56].mxu0 }
0x1496   :  { %v3164_v59 = vpop.f32.mrb[57].mxu0 }
0x1497   :  { %v2014_v61 = vpop.f32.mrb[58].mxu0 }
0x1498   :  { %v3165_v62 = vpop.f32.mrb[59].mxu0  ;;  %3169 = vmatmul.mubr.msk.bf16.vlgmr.msra.gmra.mrb[72].mxu1 %vm210_vm2, %v2019_v60 }
0x1499   :  { %3180 = vmatprep.mubr.msk.bf16.mxu1 %vm3529_vm1, %v3528_v7 }
0x149e   :  { %v2112_v63 = vpop.f32.mrb[60].mxu0 }
0x149f   :  { %v3176_v2 = vpop.f32.mrb[61].mxu0  ;;  %v2121_v3 = vsel %vm1582_vm4, %v2112_v63, -inf }
0x14a0   :  { %2122 = vmax.xlane.f32.xlu1 %v2121_v3  ;;  %v2115_v4 = vpop.f32.mrb[62].mxu0 }
0x14a1   :  { %v3177_v5 = vpop.f32.mrb[63].mxu0 }
0x14b1   :  { %2188 = vrot.lane.b32.xlu1 %v3952_v11, %s3534_s17 }
0x14b5   :  { %2288 = vrot.lane.b32.xlu1 %v3954_v13, %s3538_s21 }
0x14b9   :  { %2338 = vrot.lane.b32.xlu1 %v3952_v11, %s3538_s21 }
0x14bd   :  { %2336 = vrot.lane.b32.xlu1 %v3964_v20, %s3538_s21 }
0x152d   :  { %v2123_v6 = vpop.xlane.xlu1 %2122 }
0x152e   :  { %v2125_v9 = vsub.f32 %v2112_v63, %v2123_v6 }
0x1530   :  { %v2128_v10 = vmul.f32 1.442695, %v2125_v9 }
0x1531   :  { %v2189_v8 = vpop.permute.xlu1 %2188 }
0x1532   :  { %3185 = vmatpush3.bf16.msra.mxu0 %v2189_v8  ;;  %3353 = vpow2.f32 %v2128_v10 }
0x1533   :  { %3196 = vmatprep.subr.bf16.mxu0 %v3528_v7 }
0x1535   :  { %v2289_v31 = vpop.permute.xlu1 %2288 }
0x1536   :  { %v2294_v1 = vsel %vm210_vm2, %v2289_v31, 0 }
0x1539   :  { %v2339_v54 = vpop.permute.xlu1 %2338 }
0x153a   :  { %v2344_v59 = vsel %vm210_vm2, %v2339_v54, 0 }
0x153c   :  { %v3354_v23 = vpop.eup %3353 }
0x153d   :  { %v2133_v32 = vsel %vm1582_vm4, %v3354_v23, 0.0 }
0x1563   :  { %v1964_v12 = vpop.f32.mrb[68].mxu1 }
0x1564   :  { %v4077_v14 = vadd.f32 %v2011_v58, %v1964_v12  ;;  %v3158_v18 = vpop.f32.mrb[69].mxu1 }
0x1565   :  { %v1967_v15 = vpop.f32.mrb[70].mxu1 }
0x1566   :  { %v4079_v17 = vadd.f32 %v2014_v61, %v1967_v15  ;;  %v3159_v19 = vpop.f32.mrb[71].mxu1  ;;  %v2337_v61 = vpop.permute.xlu1 %2336 }
0x156b   :  { %v2062_v21 = vpop.f32.mrb[72].mxu1 }
0x156c   :  { %v3170_v22 = vpop.f32.mrb[73].mxu1  ;;  %v2118_v20 = vsel %vm1582_vm4, %v2062_v21, -inf }
0x156d   :  { %2119 = vmax.xlane.f32.xlu0 %v2118_v20  ;;  %v2065_v27 = vpop.f32.mrb[74].mxu1 }
0x156e   :  { %v3171_v29 = vpop.f32.mrb[75].mxu1 }
0x1571   :  { %2134 = vadd.xlane.f32.xlu0 %v2133_v32 }
0x15fa   :  { %v2120_v34 = vpop.xlane.xlu0 %2119 }
0x15fb   :  { %v2124_v36 = vsub.f32 %v2062_v21, %v2120_v34 }
0x15fd   :  { %v2126_v37 = vmul.f32 1.442695, %v2124_v36 }
0x15fe   :  { %v2135_v26 = vpop.xlane.xlu0 %2134 }
0x15ff   :  { %3355 = vpow2.f32 %v2126_v37 }
0x1600   :  { %3357 = vrcp.f32 %v2135_v26 }
0x1609   :  { %v3356_v38 = vpop.eup %3355 }
0x160a   :  { %v3358_v39 = vpop.eup %3357  ;;  %v2130_v0 = vsel %vm1582_vm4, %v3356_v38, 0.0 }
0x160b   :  { %v2139_v40 = vmul.f32 %v3358_v39, %v3354_v23  ;;  %2131 = vadd.xlane.f32.xlu0 %v2130_v0 }
0x160d   :  { %v2141_v30 = vpack.c.bf16 %v2139_v40, %v2139_v40 }
0x160f   :  { %3187 = vmatmul.mubr.msk.bf16.vlgmr.msra.gmra.mrb[64].mxu0 %vm1582_vm4, %v2141_v30 }
0x1610   :  { %3197 = vmatpush3.bf16.xpose.msra.mxu0 %v2294_v1  ;;  %3198 = vmatprep.mubr.msk.bf16.mxu0 %vm3529_vm1, %v3528_v7 }
0x1611   :  { %3208 = vmatprep.subr.bf16.mxu0 %v3528_v7 }
0x1621   :  { %2142 = vrot.lane.b32.xlu0 %v3954_v13, %s3534_s17 }
0x1625   :  { %2286 = vrot.lane.b32.xlu0 %v3962_v16, %s3538_s21 }
0x1698   :  { %v2132_v41 = vpop.xlane.xlu0 %2131 }
0x1699   :  { %3359 = vrcp.f32 %v2132_v41 }
0x169c   :  { %v2143_v42 = vpop.permute.xlu0 %2142 }
0x169d   :  { %3179 = vmatpush3.bf16.msra.mxu1 %v2143_v42 }
0x169e   :  { %3190 = vmatprep.subr.bf16.mxu1 %v3528_v7 }
0x16a0   :  { %v2287_v33 = vpop.permute.xlu0 %2286 }
0x16a1   :  { %3199 = vmatmul.mubr.msk.bf16.vlgmr.msra.gmra.mrb[68].mxu0 %vm210_vm2, %v2287_v33 }
0x16a2   :  { %3210 = vmatprep.mubr.msk.bf16.mxu0 %vm3529_vm1, %v3528_v7 }
0x16a3   :  { %v3360_v43 = vpop.eup %3359 }
0x16a4   :  { %v2138_v44 = vmul.f32 %v3360_v43, %v3356_v38 }
0x16a6   :  { %v2140_v45 = vpack.c.bf16 %v2138_v44, %v2138_v44 }
0x16a8   :  { %3181 = vmatmul.mubr.msk.bf16.vlgmr.msra.gmra.mrb[76].mxu1 %vm1582_vm4, %v2140_v45 }
0x16a9   :  { %3192 = vmatprep.mubr.msk.bf16.mxu1 %vm3529_vm1, %v3528_v7  ;;  %3191 = vmatpush3.bf16.msra.mxu1 %v2241_v49 }
0x16aa   :  { %3202 = vmatprep.subr.bf16.mxu1 %v3528_v7 }
0x16e2   :  { %v2228_v16 = vpop.f32.mrb[64].mxu0 }
0x16e3   :  { %v3188_v28 = vpop.f32.mrb[65].mxu0 }
0x16e4   :  { %v2231_v46 = vpop.f32.mrb[66].mxu0 }
0x16e5   :  { %v3189_v47 = vpop.f32.mrb[67].mxu0 }
0x1774   :  { %v2330_v50 = vpop.f32.mrb[68].mxu0 }
0x1775   :  { %v3200_v24 = vpop.f32.mrb[69].mxu0  ;;  %v2386_v51 = vsel %vm1582_vm4, %v2330_v50, -inf }
0x1776   :  { %2387 = vmax.xlane.f32.xlu0 %v2386_v51  ;;  %v2333_v52 = vpop.f32.mrb[70].mxu0 }
0x1777   :  { %v3201_v53 = vpop.f32.mrb[71].mxu0 }
0x177b   :  { %v2182_v55 = vpop.f32.mrb[76].mxu1 }
0x177c   :  { %v2234_v56 = vpack.c.bf16 %v2228_v16, %v2182_v55  ;;  %v3182_v57 = vpop.f32.mrb[77].mxu1  ;;  %v3278_v55 = vld [vmem:[%s4220_s10 + $0x10] ss:$8 sps:$4 sm:$0xff]  }
0x177d   :  { %v2185_v58 = vpop.f32.mrb[78].mxu1  ;;  %v3540_v57 = vmov 0  }
0x177e   :  { %v3183_v60 = vpop.f32.mrb[79].mxu1  ;;  %3193 = vmatmul.mubr.msk.bf16.vlgmr.msra.gmra.mrb[80].mxu1 %vm210_vm2, %v2234_v56  ;;  %v3280_v56 = vld [vmem:[%s4220_s10 + $0x14] ss:$8 sps:$4 sm:$0xff]  }
0x177f   :  { %3203 = vmatpush3.bf16.xpose.msra.mxu1 %v2344_v59  ;;  %3204 = vmatprep.mubr.msk.bf16.mxu1 %vm3529_vm1, %v3528_v7 }
0x1780   :  { %3214 = vmatprep.subr.bf16.mxu1 %v3528_v7 }
0x1786   :  { %3205 = vmatmul.mubr.msk.bf16.vlgmr.msra.gmra.mrb[84].mxu1 %vm210_vm2, %v2337_v61 }
0x1787   :  { %3216 = vmatprep.mubr.msk.bf16.mxu1 %vm3529_vm1, %v3528_v7 }
0x1803   :  { %v2388_v62 = vpop.xlane.xlu0 %2387 }
0x1804   :  { %v2392_v63 = vsub.f32 %v2330_v50, %v2388_v62 }
0x1806   :  { %v2394_v2 = vmul.f32 1.442695, %v2392_v63 }
0x1808   :  { %3361 = vpow2.f32 %v2394_v2 }
0x1812   :  { %v3362_v3 = vpop.eup %3361 }
0x1813   :  { %v2398_v4 = vsel %vm1582_vm4, %v3362_v3, 0.0 }
0x1814   :  { %2399 = vadd.xlane.f32.xlu0 %v2398_v4 }
0x1851   :  { %v2277_v5 = vpop.f32.mrb[80].mxu1 }
0x1852   :  { %v2284_v6 = vadd.f32 %v2277_v5, %v4077_v14  ;;  %v3194_v8 = vpop.f32.mrb[81].mxu1  ;;  %v2849_v5 = vld [vmem:[#allocation2] ss:$0 sm:$0xff] }
0x1853   :  { %v2280_v9 = vpop.f32.mrb[82].mxu1 }
0x1854   :  { %v2285_v10 = vadd.f32 %v2280_v9, %v4079_v17  ;;  %v3195_v12 = vpop.f32.mrb[83].mxu1 }
0x1855   :  { %v3281_v12 = vld [vmem:[%s4221_s11] sm:$0xff]  }
0x1859   :  { %v2380_v18 = vpop.f32.mrb[84].mxu1 }
0x185a   :  { %v3206_v15 = vpop.f32.mrb[85].mxu1  ;;  %v2389_v19 = vsel %vm1582_vm4, %v2380_v18, -inf }
0x185b   :  { %2390 = vmax.xlane.f32.xlu1 %v2389_v19  ;;  %v2383_v21 = vpop.f32.mrb[86].mxu1  ;;  %v3283_v15 = vld [vmem:[%s4221_s11 + $0x10] sm:$0xff]   ;;  %v3284_v19 = vld [vmem:[%s4221_s11 + $0x18] sm:$0xff]  }
0x185c   :  { %v3207_v22 = vpop.f32.mrb[87].mxu1  ;;  %v3285_v21 = vld [vmem:[%s4221_s11 + $0x20] sm:$0xff]  }
0x185d   :  { %v3286_v22 = vld [vmem:[%s4221_s11 + $0x28] sm:$0xff]  }
0x186c   :  { %2456 = vrot.lane.b32.xlu1 %v3952_v11, %s3537_s20 }
0x18a1   :  { %v2400_v32 = vpop.xlane.xlu0 %2399 }
0x18e8   :  { %v2391_v20 = vpop.xlane.xlu1 %2390 }
0x18e9   :  { %v2393_v23 = vsub.f32 %v2380_v18, %v2391_v20  ;;  %v3282_v18 = vld [vmem:[%s4221_s11 + $0x8] sm:$0xff]   ;;  %v3287_v20 = vld [vmem:[%s4221_s11 + $0x30] sm:$0xff]  }
0x18eb   :  { %v2396_v27 = vmul.f32 1.442695, %v2393_v23  ;;  %v3288_v23 = vld [vmem:[%s4221_s11 + $0x38] sm:$0xff]   ;;  %s3541_s11 = smov [#allocation11]  }
0x18ec   :  { %v2457_v29 = vpop.permute.xlu1 %2456  ;;  %s2780_s15 = sshll.u32 %s3541_s11, 4  ;;  %s2781_s15 = int_to_ptr.vmem [resolvable:$true] %s2780_s15 }
0x18ed   :  { %3363 = vpow2.f32 %v2396_v27  ;;  %3215 = vmatpush3.bf16.msra.mxu1 %v2457_v29  ;;  %s3491_s16 = scalar_lea.vmem %s2781_s15, 256  ;;  %p3496_p13 = scmp.lt.s32.totalorder %s2781_s15, %s2781_s15 }
0x18ee   :  { %3365 = vrcp.f32 %v2400_v32  ;;  %p3492_p12 = scmp.ne.s32.totalorder %s2781_s15, %s3491_s16  ;;  %p3497_p0 = scmp.lt.s32.totalorder %s3491_s16, %s3491_s16 }
0x18f0   :  { %p3498_p1 = por %p3497_p0, %p3496_p13 }
0x18f2   :  { %p3499_p2 = pnand %p3498_p1, %p3492_p12 }
0x18f7   :  { %v3364_v14 = vpop.eup %3363 }
0x18f8   :  { %v2401_v17 = vsel %vm1582_vm4, %v3364_v14, 0.0  ;;  %v3366_v34 = vpop.eup %3365 }
0x18f9   :  { %2402 = vadd.xlane.f32.xlu0 %v2401_v17  ;;  %v2406_v37 = vmul.f32 %v3366_v34, %v3362_v3 }
0x18fb   :  { %v2408_v26 = vpack.c.bf16 %v2406_v37, %v2406_v37 }
0x190f   :  { %2410 = vrot.lane.b32.xlu0 %v3954_v13, %s3537_s20  ;;  %v2847_v13 = vld [vmem:[%s4219_s9 + $0xc] sm:$0xf] }
0x1910   :  { %v2509_v40 = vsel %vm335_vm3, %v2847_v13, 0 }
0x1986   :  { %v2403_v36 = vpop.xlane.xlu0 %2402 }
0x1987   :  { %3367 = vrcp.f32 %v2403_v36 }
0x198a   :  { %v2411_v11 = vpop.permute.xlu0 %2410 }
0x198b   :  { %3209 = vmatpush3.bf16.msra.mxu0 %v2411_v11 }
0x198c   :  { %3220 = vmatprep.subr.bf16.mxu0 %v3528_v7 }
0x198e   :  { %3211 = vmatmul.mubr.msk.bf16.vlgmr.msra.gmra.mrb[72].mxu0 %vm1582_vm4, %v2408_v26 }
0x198f   :  { %3222 = vmatprep.mubr.msk.bf16.mxu0 %vm3529_vm1, %v3528_v7  ;;  %3221 = vmatpush3.bf16.msra.mxu0 %v2509_v40 }
0x1990   :  { %3226 = vmatprep.subr.bf16.mxu0 %v3528_v7 }
0x1991   :  { %v3368_v38 = vpop.eup %3367 }
0x1992   :  { %v2407_v39 = vmul.f32 %v3368_v38, %v3364_v14 }
0x1994   :  { %v2409_v0 = vpack.c.bf16 %v2407_v39, %v2407_v39 }
0x1996   :  { %3217 = vmatmul.mubr.msk.bf16.vlgmr.msra.gmra.mrb[88].mxu1 %vm1582_vm4, %v2409_v0 }
0x1997   :  { %2640 = vmatprep.mubr.bf16.mxu1 %v3540_v57 }
0x1a61   :  { %v2450_v31 = vpop.f32.mrb[72].mxu0 }
0x1a62   :  { %v3212_v30 = vpop.f32.mrb[73].mxu0 }
0x1a63   :  { %v2453_v1 = vpop.f32.mrb[74].mxu0 }
0x1a64   :  { %v3213_v41 = vpop.f32.mrb[75].mxu0 }
0x1a69   :  { %v2496_v42 = vpop.f32.mrb[88].mxu1 }
0x1a6a   :  { %v2502_v33 = vpack.c.bf16 %v2496_v42, %v2450_v31  ;;  %v3218_v43 = vpop.f32.mrb[89].mxu1 }
0x1a6b   :  { %v2499_v44 = vpop.f32.mrb[90].mxu1 }
0x1a6c   :  { %v3219_v45 = vpop.f32.mrb[91].mxu1  ;;  %3223 = vmatmul.mubr.msk.bf16.vlgmr.msra.gmra.mrb[76].mxu0 %vm210_vm2, %v2502_v33 }
0x1a6d   :  { %3242 = vmatprep.mubr.msk.bf16.mxu0 %vm3529_vm1, %v3528_v7  ;;  %3227 = vmatpush3.bf16.msra.mxu0 %v3281_v12 }
0x1a6e   :  { %3228 = vmatprep.subr.bf16.mxu0 %v3528_v7 }
0x1a71   :  { %3229 = vmatpush3.bf16.msra.mxu0 %v3282_v18 }
0x1a72   :  { %3230 = vmatprep.subr.bf16.mxu0 %v3528_v7 }
0x1a75   :  { %3231 = vmatpush3.bf16.msra.mxu0 %v3283_v15 }
0x1a76   :  { %3232 = vmatprep.subr.bf16.mxu0 %v3528_v7 }
0x1a79   :  { %3233 = vmatpush3.bf16.msra.mxu0 %v3284_v19 }
0x1a7a   :  { %3234 = vmatprep.subr.bf16.mxu0 %v3528_v7 }
0x1a7d   :  { %3235 = vmatpush3.bf16.msra.mxu0 %v3285_v21 }
0x1a7e   :  { %3236 = vmatprep.subr.bf16.mxu0 %v3528_v7 }
0x1a81   :  { %3237 = vmatpush3.bf16.msra.mxu0 %v3286_v22 }
0x1a82   :  { %3238 = vmatprep.subr.bf16.mxu0 %v3528_v7 }
0x1a85   :  { %3239 = vmatpush3.bf16.msra.mxu0 %v3287_v20 }
0x1a86   :  { %3240 = vmatprep.subr.bf16.mxu0 %v3528_v7 }
0x1a89   :  { %3241 = vmatpush3.bf16.msra.mxu0 %v3288_v23 }
0x1b3f   :  { %v2545_v16 = vpop.f32.mrb[76].mxu0 }
0x1b40   :  { %v2552_v28 = vadd.f32 %v2545_v16, %v2284_v6  ;;  %v3224_v46 = vpop.f32.mrb[77].mxu0 }
0x1b41   :  { %v2548_v47 = vpop.f32.mrb[78].mxu0 }
0x1b42   :  { %v4137_v48 = vadd.f32 %v2552_v28, %v3921_v25  ;;  %v2553_v49 = vadd.f32 %v2548_v47, %v2285_v10  ;;  %v3225_v50 = vpop.f32.mrb[79].mxu0  ;;  %v3277_v25 = vld [vmem:[%s4220_s10 + $0x4] ss:$8 sps:$4 sm:$0xff]  }
0x1b43   :  { %2608 = vmatprep.subr.bf16.mxu1 %v3277_v25 }
0x1b44   :  { %v4140_v24 = vadd.f32 %v2553_v49, %v3925_v35  ;;  %v2556_v51 = vmul.f32 %v4137_v48, %v4137_v48  ;;  %v3275_v35 = vld [vmem:[%s4220_s10] ss:$8 sps:$4 sm:$0xff]  }
0x1b45   :  { %2609 = vmatpush1.bf16.msra.mxu1 %v3275_v35 }
0x1b46   :  { %v2558_v52 = vsel %vm120_vm0, %v2556_v51, 0.0  ;;  %v2557_v53 = vmul.f32 %v4140_v24, %v4140_v24  ;;  %2610 = vmatprep.subr.bf16.mxu1 %v3280_v56 }
0x1b47   :  { %2559 = vadd.xlane.f32.xlu1 %v2558_v52 }
0x1b48   :  { %v2561_v54 = vsel %vm120_vm0, %v2557_v53, 0.0 }
0x1b49   :  { %2562 = vadd.xlane.f32.xlu0 %v2561_v54  ;;  %2611 = vmatpush1.bf16.msra.mxu1 %v3278_v55 }
0x1bd4   :  { %v2560_v58 = vpop.xlane.xlu1 %2559 }
0x1bd5   :  { %v2564_v59 = vmul.f32 0.03125, %v2560_v58 }
0x1bd6   :  { %v2563_v60 = vpop.xlane.xlu0 %2562 }
0x1bd7   :  { %v2566_v61 = vadd.f32 1e-06, %v2564_v59  ;;  %v2565_v62 = vmul.f32 0.03125, %v2563_v60 }
0x1bd9   :  { %3369 = vrsqrt.f32 %v2566_v61  ;;  %v2567_v63 = vadd.f32 1e-06, %v2565_v62 }
0x1bdb   :  { %3371 = vrsqrt.f32 %v2567_v63 }
0x1be3   :  { %v3370_v2 = vpop.eup %3369 }
0x1be4   :  { %v2570_v3 = vmul.f32 %v3370_v2, %v4137_v48 }
0x1be5   :  { %v3372_v4 = vpop.eup %3371 }
0x1be6   :  { %v2571_v6 = vmul.f32 %v3372_v4, %v4140_v24  ;;  %v2578_v8 = vmul.f32 %v2849_v5, %v2570_v3 }
0x1be8   :  { %v2579_v9 = vmul.f32 %v2849_v5, %v2571_v6 }
0x1bea   :  { %v2580_v10 = vpack.c.bf16 %v2579_v9, %v2578_v8 }
0x1bec   :  { %2854 = vmatmul.mubr.msk.bf16.vlgmr.msra.gmra.mrb[92].mxu1 %vm120_vm0, %v2580_v10 }
0x1cbf   :  { %v2642_v27 = vpop.f32.mrb[92].mxu1 }
0x1cc0   :  { %v2651_v29 = vsub.f32 0.0, %v2642_v27  ;;  %v2644_v14 = vpop.f32.mrb[93].mxu1 }
0x1cc1   :  { %v2646_v17 = vpop.f32.mrb[94].mxu1 }
0x1cc2   :  { %v2653_v32 = vmul.f32 1.442695, %v2651_v29  ;;  %v2652_v34 = vsub.f32 0.0, %v2646_v17  ;;  %v2648_v36 = vpop.f32.mrb[95].mxu1 }
0x1cc4   :  { %3373 = vpow2.f32 %v2653_v32  ;;  %v2655_v37 = vmul.f32 1.442695, %v2652_v34 }
0x1cc6   :  { %3375 = vpow2.f32 %v2655_v37 }
0x1cce   :  { %v3374_v11 = vpop.eup %3373 }
0x1ccf   :  { %v2657_v26 = vadd.f32 1.0, %v3374_v11 }
0x1cd0   :  { %v3376_v38 = vpop.eup %3375 }
0x1cd1   :  { %3377 = vrcp.f32 %v2657_v26  ;;  %v2658_v7 = vadd.f32 1.0, %v3376_v38 }
0x1cd3   :  { %3379 = vrcp.f32 %v2658_v7 }
0x1cdb   :  { %v3378_v39 = vpop.eup %3377 }
0x1cdc   :  { %v2661_v0 = vmul.f32 %v3378_v39, %v2642_v27 }
0x1cdd   :  { %v3380_v13 = vpop.eup %3379 }
0x1cde   :  { %v2663_v40 = vmul.f32 %v2661_v0, %v2644_v14  ;;  %v2662_v31 = vmul.f32 %v3380_v13, %v2646_v17 }
0x1ce0   :  { %v2664_v30 = vmul.f32 %v2662_v31, %v2648_v36 }
0x1ce2   :  { %v2665_v1 = vpack.c.bf16 %v2664_v30, %v2663_v40 }
0x1ce4   :  { %3243 = vmatmul.mubr.bf16.vlgmr.msra.gmra.mrb[80].mxu0 %v2665_v1 }
0x1db7   :  { %v2764_v41 = vpop.f32.mrb[80].mxu0 }
0x1db8   :  { %v2771_v42 = vadd.f32 %v2764_v41, %v4137_v48  ;;  %v3244_v33 = vpop.f32.mrb[81].mxu0 }
0x1db9   :  { %v2767_v43 = vpop.f32.mrb[82].mxu0 }
0x1dba   :  { %2773 = vst.msk [vmem:[#allocation11] sm:$0xff] %vm120_vm0, %v2771_v42  ;;  %v2772_v44 = vadd.f32 %v2767_v43, %v4140_v24  ;;  %v3245_v45 = vpop.f32.mrb[83].mxu0 }
0x1dbc   :  { %2774 = vst.msk [vmem:[#allocation11 + $0x8] sm:$0xff] %vm120_vm0, %v2772_v44 }
0x1dbd   :  { %3502 = shalt.err (!%p3499_p2)
}
0x1dbe   :  { %s3503_s14 = scalar_lea.hbm %s4222_s12, 256 }
0x1dbf   :  { %p3504_p3 = scmp.ne.s32.totalorder %s4222_s12, %s3503_s14  ;;  %p3507_p4 = scmp.lt.u32.totalorder %s3503_s14, %s4222_s12 }
0x1dc1   :  { %p3509_p5 = pnand %p3507_p4, %p3504_p3 }
0x1dc3   :  { %3512 = shalt.err (!%p3509_p5)
}
0x1dc4   :  { %s3542_s17 = smov 128   ;;  %s3543_s19 = smov 8  }
0x1dc5   :  { %2786 = dma.vmem_to_hbm [thread:$0]  %s2781_s15, 256, %s4222_s12, [#allocation4], %s3542_s17, %s3542_s17, %s3543_s19  }
0x1dc6   :  { %3519 = dma.done.wait [#allocation4], 256  }
0x1dc7   :  { %3520 = vsyncadd [#allocation4], 4294967040 }
0x1dc8   :  { %2790 = vsyncpa [#allocation3], 1 }
0x1dc9   :  { %2791 = vsyncpa [#allocation6], 1 }
0x1dca   :  { %2792 = vsyncpa [#allocation9], 1 }
0x1dcb   :  { %2793 = vsyncpa [#allocation4], 1 }

</bundles_post_ra>
